<compile_context>
chip_gen: v5e
topology: v5e:2x2
jax: 0.10.0
libtpu: 0.0.40
codegen_flags: <defaults>
</compile_context>

<pallas_src>
import jax
import jax.numpy as jnp
from jax import lax
from jax.experimental import pallas as pl
from jax.experimental.pallas import tpu as pltpu


def gat_gate_kernel(x_ref, adj_ref, wT_ref, a_ref, vec_ref, gb_ref, out_ref):
    # x_ref:   (R, D)  flattened node features for this batch tile (R = bt*N)
    # adj_ref: (R, R)  block-diagonal adjacency for this batch tile
    # wT_ref:  (D, D)  W.weight transposed (in, out)
    # a_ref:   (D, D)  A + A.T (the e + e^T symmetrization pre-folded)
    # vec_ref: (8, D)  row 0: W.bias, row 1: gate.weight[:, :D] (acts on x),
    #                  row 2: gate.weight[:, D:] (acts on h_prime), rest zero
    # gb_ref:  (1, 1)  gate.bias (SMEM scalar)
    # out_ref: (R, D)
    x = x_ref[...]                                    # (R, D) f32
    adj = adj_ref[...]                                # (R, R) f32

    wb = vec_ref[0:1, :]                              # (1, D)
    gwx = vec_ref[1:2, :]                             # (1, D)
    gwh = vec_ref[2:3, :]                             # (1, D)

    # Fused projections: one (R, D) @ (D, D) MXU call each (kept f32 so the
    # residual path stays accurate).
    h = jnp.dot(x, wT_ref[...], preferred_element_type=jnp.float32) + wb
    hA = jnp.dot(h, a_ref[...], preferred_element_type=jnp.float32)

    # Lane-dense attention scores for the whole batch tile:
    #   e[i, j] = sum_l (h A_sym)[i, l] * h[j, l]
    # (== e + e^T of the module since A is pre-symmetrized; no explicit
    # transpose of h is materialized).  Off-block (cross-graph) pairs are
    # junk here and get masked to -9e15 below.
    h_b = h.astype(jnp.bfloat16)
    e = lax.dot_general(hA.astype(jnp.bfloat16), h_b,
                        (((1,), (1,)), ((), ())),
                        preferred_element_type=jnp.float32)        # (R, R)

    # Masked softmax over axis 0 (== dim=1 of the (B, N, N) layout), then
    # re-mask with adj.  Off-block entries exp-underflow to exactly 0, so the
    # block-diagonal batching is numerically identical to per-graph softmax.
    neg = jnp.float32(-9.0e15)
    att = jnp.where(adj > 0, e, neg)
    att = att - jnp.max(att, axis=0, keepdims=True)
    att = jnp.exp(att)
    att = att * pl.reciprocal(jnp.sum(att, axis=0, keepdims=True), approx=True)
    att = att * adj

    # h_prime = relu(att @ h): one (R, R) @ (R, D) MXU matmul.
    h_prime = jnp.dot(att.astype(jnp.bfloat16), h_b,
                      preferred_element_type=jnp.float32)
    h_prime = jnp.maximum(h_prime, 0.0)

    # Gate on the VPU/XLU (a (R, D) @ (D, 1) matmul would waste the MXU):
    #   coeff = sigmoid(gate(cat([x, h_prime], -1)))  -> (R, 1)
    gate_logit = (jnp.sum(x * gwx + h_prime * gwh, axis=-1, keepdims=True)
                  + gb_ref[0, 0])
    coeff = jax.nn.sigmoid(gate_logit)

    out_ref[...] = coeff * x + (1.0 - coeff) * h_prime


def _tensorcores_per_chip():
    """2 on v7x-class (multi-TC) parts, 1 on single-TC v5e / v6e."""
    try:
        kind = jax.devices()[0].device_kind.lower()
    except Exception:
        return 2
    single_tc = ("lite" in kind) or ("v5e" in kind) or ("v6e" in kind)
    return 1 if single_tc else 2


def _block_diag_adj(adj, graphs_per_step):
    """(B, N, N) -> (B//bt, bt*N, bt*N) block-diagonal adjacency tiles."""
    B, N, _ = adj.shape
    G = B // graphs_per_step
    adj_g = adj.reshape(G, graphs_per_step, N, N)
    eye = jnp.eye(graphs_per_step, dtype=adj.dtype)
    bd = jnp.einsum('gpij,pq->gpiqj', adj_g, eye)
    return bd.reshape(G, graphs_per_step * N, graphs_per_step * N)


def gat_gate_forward(x, adj, w_weight, w_bias, A, gate_weight, gate_bias,
                     *, graphs_per_step=None):
    B, N, D = x.shape
    assert adj.shape == (B, N, N)
    assert w_weight.shape == (D, D), "gated residual needs n_in == n_out"

    # Grid choice: 1 step on single-TC chips (v5e/v6e), 2 parallel steps on
    # multi-TC chips (v7x) so both TensorCores get work.
    if graphs_per_step is None:
        steps = max(1, min(_tensorcores_per_chip(), B))
        if B % steps != 0:
            steps = 1
        graphs_per_step = B // steps
    assert B % graphs_per_step == 0
    G = B // graphs_per_step
    R = graphs_per_step * N                    # flattened rows per grid step

    # One-time parameter plumbing (plain JAX glue outside the kernel).
    wT = w_weight.T                            # (D, D): x @ W^T
    a_sym = A + A.T                            # fold e + e^T into A
    vec_params = jnp.zeros((8, D), jnp.float32)
    vec_params = vec_params.at[0].set(w_bias)             # W.bias
    vec_params = vec_params.at[1].set(gate_weight[0, :D])  # gate part on x
    vec_params = vec_params.at[2].set(gate_weight[0, D:])  # gate part on h'
    gb = gate_bias.reshape(1, 1).astype(jnp.float32)

    x2 = x.reshape(B * N, D)                   # zero-cost metadata reshape
    adj_bd = _block_diag_adj(adj, graphs_per_step)          # (G, R, R)

    out2 = pl.pallas_call(
        gat_gate_kernel,
        out_shape=jax.ShapeDtypeStruct((B * N, D), jnp.float32),
        grid_spec=pltpu.PrefetchScalarGridSpec(
            num_scalar_prefetch=0,
            grid=(G,),
            in_specs=[
                pl.BlockSpec((R, D), lambda b: (b, 0)),            # x (flat)
                pl.BlockSpec((None, R, R), lambda b: (b, 0, 0)),   # adj blkdiag
                pl.BlockSpec((D, D), lambda b: (0, 0)),            # W^T
                pl.BlockSpec((D, D), lambda b: (0, 0)),            # A + A^T
                pl.BlockSpec((8, D), lambda b: (0, 0)),            # packed vecs
                pl.BlockSpec(memory_space=pltpu.MemorySpace.SMEM),  # gate bias
            ],
            out_specs=pl.BlockSpec((R, D), lambda b: (b, 0)),
        ),
        compiler_params=pltpu.CompilerParams(
            dimension_semantics=("parallel",)),
    )(x2, adj_bd, wT, a_sym, vec_params, gb)
    return out2.reshape(B, N, D)


def _reference(x, adj, w_weight, w_bias, A, gate_weight, gate_bias):
    # Pure-JAX reference mirroring the PyTorch forward exactly (f32).
    h = jnp.einsum('bnd,od->bno', x, w_weight) + w_bias
    e = jnp.einsum('ijl,ikl->ijk', jnp.matmul(h, A), h)
    e = e + jnp.transpose(e, (0, 2, 1))
    att = jnp.where(adj > 0, e, jnp.full_like(e, -9.0e15))
    att = jax.nn.softmax(att, axis=1)
    att = att * adj
    h_prime = jax.nn.relu(jnp.einsum('aij,ajk->aik', att, h))
    gate_in = jnp.concatenate([x, h_prime], axis=-1)
    coeff = jax.nn.sigmoid(jnp.einsum('bnd,od->bno', gate_in, gate_weight)
                           + gate_bias)
    return coeff * x + (1.0 - coeff) * h_prime


if __name__ == "__main__":
    # Batched enough that the v7x path gets a 2-step parallel grid with
    # R = 128 flattened rows per step, while v5e/v6e run one R = 256 step.
    B, N, D = 16, 16, 32   # n_in_feature == n_out_feature == D

    key = jax.random.PRNGKey(0)
    kx, kadj, kw, kwb, ka, kg, kgb = jax.random.split(key, 7)

    x = jax.random.normal(kx, (B, N, D), dtype=jnp.float32)

    # symmetric binary adjacency with self-loops (precondition: every node
    # has at least one unmasked neighbour so the masked softmax is well posed)
    raw = jax.random.uniform(kadj, (B, N, N))
    adj = (raw > 0.6).astype(jnp.float32)
    adj = jnp.maximum(adj, jnp.transpose(adj, (0, 2, 1)))
    adj = jnp.maximum(adj, jnp.eye(N, dtype=jnp.float32)[None])

    # deterministic synthetic parameters (module shapes from __init__)
    w_weight = 0.1 * jax.random.normal(kw, (D, D), dtype=jnp.float32)         # W.weight (out, in)
    w_bias = 0.1 * jax.random.normal(kwb, (D,), dtype=jnp.float32)            # W.bias
    A = 0.1 * jax.random.normal(ka, (D, D), dtype=jnp.float32)                # A param
    gate_weight = 0.1 * jax.random.normal(kg, (1, 2 * D), dtype=jnp.float32)  # gate.weight (1, 2D)
    gate_bias = 0.1 * jax.random.normal(kgb, (1,), dtype=jnp.float32)         # gate.bias

    out = gat_gate_forward(x, adj, w_weight, w_bias, A, gate_weight, gate_bias)
    out = jax.block_until_ready(out)

    ref = _reference(x, adj, w_weight, w_bias, A, gate_weight, gate_bias)
    assert out.shape == (B, N, D)
    # Tolerance covers the bf16 MXU inputs for the two attention matmuls and
    # the approx (EUP) reciprocal in the softmax denominator; everything else
    # is f32 / mathematically identical to the PyTorch forward.
    assert jnp.allclose(out, ref, atol=2e-2, rtol=2e-2), "mismatch vs reference"

    print("KERNEL_OK")
</pallas_src>

<mosaic_0001>
module attributes {stable_mosaic.version = 11 : i64} {
  func.func @gat_gate_kernel(%arg0: i32, %arg1: memref<128x32xf32, #tpu.memory_space<vmem>>, %arg2: memref<1x128x128xf32, #tpu.memory_space<vmem>>, %arg3: memref<32x32xf32, #tpu.memory_space<vmem>>, %arg4: memref<32x32xf32, #tpu.memory_space<vmem>>, %arg5: memref<8x32xf32, #tpu.memory_space<vmem>>, %arg6: memref<1x1xf32, #tpu.memory_space<smem>>, %arg7: memref<128x32xf32, #tpu.memory_space<vmem>>) attributes {dimension_semantics = [#tpu.dimension_semantics<parallel>], iteration_bounds = array<i64: 2>, scalar_prefetch = 0 : i64, scratch_operands = 0 : i64, tpu.core_type = #tpu.core_type<tc>, window_params = [{transform_indices = @transform_0, window_bounds = array<i64: 128, 32>}, {transform_indices = @transform_1, window_bounds = array<i64: 1, 128, 128>}, {pipeline_mode = #tpu.pipeline_mode<synchronous>, transform_indices = @transform_2, window_bounds = array<i64: 32, 32>}, {pipeline_mode = #tpu.pipeline_mode<synchronous>, transform_indices = @transform_3, window_bounds = array<i64: 32, 32>}, {pipeline_mode = #tpu.pipeline_mode<synchronous>, transform_indices = @transform_4, window_bounds = array<i64: 8, 32>}, {transform_indices = @transform_5, window_bounds = array<i64: 1, 1>}, {transform_indices = @transform_6, window_bounds = array<i64: 128, 32>}]} {
    %c0 = arith.constant 0 : index
    %c0_0 = arith.constant 0 : index
    %0 = vector.load %arg1[%c0, %c0_0] : memref<128x32xf32, #tpu.memory_space<vmem>>, vector<128x32xf32>
    %c0_1 = arith.constant 0 : index
    %c0_2 = arith.constant 0 : index
    %c0_3 = arith.constant 0 : index
    %1 = vector.load %arg2[%c0_1, %c0_2, %c0_3] : memref<1x128x128xf32, #tpu.memory_space<vmem>>, vector<1x128x128xf32>
    %2 = vector.shape_cast %1 : vector<1x128x128xf32> to vector<128x128xf32>
    %c0_4 = arith.constant 0 : index
    %c0_5 = arith.constant 0 : index
    %3 = vector.load %arg5[%c0_4, %c0_5] : memref<8x32xf32, #tpu.memory_space<vmem>>, vector<1x32xf32>
    %c1 = arith.constant 1 : index
    %c0_6 = arith.constant 0 : index
    %4 = vector.load %arg5[%c1, %c0_6] : memref<8x32xf32, #tpu.memory_space<vmem>>, vector<1x32xf32>
    %c2 = arith.constant 2 : index
    %c0_7 = arith.constant 0 : index
    %5 = vector.load %arg5[%c2, %c0_7] : memref<8x32xf32, #tpu.memory_space<vmem>>, vector<1x32xf32>
    %c0_8 = arith.constant 0 : index
    %c0_9 = arith.constant 0 : index
    %6 = vector.load %arg3[%c0_8, %c0_9] : memref<32x32xf32, #tpu.memory_space<vmem>>, vector<32x32xf32>
    %cst = arith.constant dense<0.000000e+00> : vector<128x32xf32>
    %7 = tpu.matmul %0, %6, %cst {dimension_numbers = #tpu.dot_dimension_numbers<[1], [0], [0], [1], [0, 0, 1, 1], [], []>} : vector<128x32xf32>, vector<32x32xf32>, vector<128x32xf32> -> vector<128x32xf32>
    %8 = vector.broadcast %3 : vector<1x32xf32> to vector<128x32xf32>
    %9 = arith.addf %7, %8 : vector<128x32xf32>
    %c0_10 = arith.constant 0 : index
    %c0_11 = arith.constant 0 : index
    %10 = vector.load %arg4[%c0_10, %c0_11] : memref<32x32xf32, #tpu.memory_space<vmem>>, vector<32x32xf32>
    %cst_12 = arith.constant dense<0.000000e+00> : vector<128x32xf32>
    %11 = tpu.matmul %9, %10, %cst_12 {dimension_numbers = #tpu.dot_dimension_numbers<[1], [0], [0], [1], [0, 0, 1, 1], [], []>} : vector<128x32xf32>, vector<32x32xf32>, vector<128x32xf32> -> vector<128x32xf32>
    %12 = arith.truncf %9 : vector<128x32xf32> to vector<128x32xbf16>
    %13 = arith.truncf %11 : vector<128x32xf32> to vector<128x32xbf16>
    %cst_13 = arith.constant dense<0.000000e+00> : vector<128x128xf32>
    %14 = tpu.matmul %13, %12, %cst_13 {dimension_numbers = #tpu.dot_dimension_numbers<[1], [1], [0], [0], [0, 0, 1, 0], [], []>} : vector<128x32xbf16>, vector<128x32xbf16>, vector<128x128xf32> -> vector<128x128xf32>
    %cst_14 = arith.constant 0.000000e+00 : f32
    %15 = vector.broadcast %cst_14 : f32 to vector<128x128xf32>
    %16 = arith.cmpf ogt, %2, %15 : vector<128x128xf32>
    %cst_15 = arith.constant -9.000000e+15 : f32
    %17 = vector.broadcast %cst_15 : f32 to vector<128x128xf32>
    %18 = arith.select %16, %14, %17 : vector<128x128xi1>, vector<128x128xf32>
    %cst_16 = arith.constant dense<0xFF800000> : vector<128xf32>
    %19 = vector.multi_reduction <maximumf>, %18, %cst_16 [0] : vector<128x128xf32> to vector<128xf32>
    %20 = vector.shape_cast %19 : vector<128xf32> to vector<1x128xf32>
    %21 = vector.broadcast %20 : vector<1x128xf32> to vector<128x128xf32>
    %22 = arith.subf %18, %21 : vector<128x128xf32>
    %23 = math.exp %22 : vector<128x128xf32>
    %cst_17 = arith.constant dense<0.000000e+00> : vector<128xf32>
    %24 = vector.multi_reduction <add>, %23, %cst_17 [0] : vector<128x128xf32> to vector<128xf32>
    %25 = vector.shape_cast %24 : vector<128xf32> to vector<1x128xf32>
    %26 = tpu.reciprocal %25 {approx = true} : vector<1x128xf32> -> vector<1x128xf32>
    %27 = vector.broadcast %26 : vector<1x128xf32> to vector<128x128xf32>
    %28 = arith.mulf %23, %27 : vector<128x128xf32>
    %29 = arith.mulf %28, %2 : vector<128x128xf32>
    %30 = arith.truncf %29 : vector<128x128xf32> to vector<128x128xbf16>
    %cst_18 = arith.constant dense<0.000000e+00> : vector<128x32xf32>
    %31 = tpu.matmul %30, %12, %cst_18 {dimension_numbers = #tpu.dot_dimension_numbers<[1], [0], [0], [1], [0, 0, 1, 1], [], []>} : vector<128x128xbf16>, vector<128x32xbf16>, vector<128x32xf32> -> vector<128x32xf32>
    %cst_19 = arith.constant 0.000000e+00 : f32
    %32 = vector.broadcast %cst_19 : f32 to vector<128x32xf32>
    %33 = arith.maximumf %31, %32 : vector<128x32xf32>
    %34 = vector.broadcast %4 : vector<1x32xf32> to vector<128x32xf32>
    %35 = arith.mulf %0, %34 : vector<128x32xf32>
    %36 = vector.broadcast %5 : vector<1x32xf32> to vector<128x32xf32>
    %37 = arith.mulf %33, %36 : vector<128x32xf32>
    %38 = arith.addf %35, %37 : vector<128x32xf32>
    %cst_20 = arith.constant dense<0.000000e+00> : vector<128xf32>
    %39 = vector.multi_reduction <add>, %38, %cst_20 [1] : vector<128x32xf32> to vector<128xf32>
    %40 = vector.shape_cast %39 : vector<128xf32> to vector<128x1xf32>
    %c0_21 = arith.constant 0 : index
    %c0_22 = arith.constant 0 : index
    %41 = memref.load %arg6[%c0_21, %c0_22] : memref<1x1xf32, #tpu.memory_space<smem>>
    %42 = vector.broadcast %41 : f32 to vector<128x1xf32>
    %43 = arith.addf %40, %42 : vector<128x1xf32>
    %44 = arith.negf %43 : vector<128x1xf32>
    %45 = math.exp %44 : vector<128x1xf32>
    %cst_23 = arith.constant 1.000000e+00 : f32
    %46 = vector.broadcast %cst_23 : f32 to vector<128x1xf32>
    %47 = arith.addf %46, %45 : vector<128x1xf32>
    %48 = arith.divf %46, %47 : vector<128x1xf32>
    %49 = vector.broadcast %48 : vector<128x1xf32> to vector<128x32xf32>
    %50 = arith.mulf %49, %0 : vector<128x32xf32>
    %cst_24 = arith.constant 1.000000e+00 : f32
    %51 = vector.broadcast %cst_24 : f32 to vector<128x1xf32>
    %52 = arith.subf %51, %48 : vector<128x1xf32>
    %53 = vector.broadcast %52 : vector<128x1xf32> to vector<128x32xf32>
    %54 = arith.mulf %53, %33 : vector<128x32xf32>
    %55 = arith.addf %50, %54 : vector<128x32xf32>
    %c0_25 = arith.constant 0 : index
    %c0_26 = arith.constant 0 : index
    %56 = vector.load %arg7[%c0_25, %c0_26] : memref<128x32xf32, #tpu.memory_space<vmem>>, vector<128x32xf32>
    tpu.vector_store %arg7[%c0_25, %c0_26], %55 {strides = array<i32>} : memref<128x32xf32, #tpu.memory_space<vmem>>, vector<128x32xf32>,
    return
  }
  func.func @transform_0(%arg0: i32) -> (i32, i32) {
    %c0_i32 = arith.constant 0 : i32
    %c0_i32_0 = arith.constant 0 : i32
    return %arg0, %c0_i32 : i32, i32
  }
  func.func @transform_1(%arg0: i32) -> (i32, i32, i32) {
    %c0_i32 = arith.constant 0 : i32
    %c0_i32_0 = arith.constant 0 : i32
    %c0_i32_1 = arith.constant 0 : i32
    return %arg0, %c0_i32, %c0_i32_0 : i32, i32, i32
  }
  func.func @transform_2(%arg0: i32) -> (i32, i32) {
    %c0_i32 = arith.constant 0 : i32
    %c0_i32_0 = arith.constant 0 : i32
    %c0_i32_1 = arith.constant 0 : i32
    return %c0_i32, %c0_i32_0 : i32, i32
  }
  func.func @transform_3(%arg0: i32) -> (i32, i32) {
    %c0_i32 = arith.constant 0 : i32
    %c0_i32_0 = arith.constant 0 : i32
    %c0_i32_1 = arith.constant 0 : i32
    return %c0_i32, %c0_i32_0 : i32, i32
  }
  func.func @transform_4(%arg0: i32) -> (i32, i32) {
    %c0_i32 = arith.constant 0 : i32
    %c0_i32_0 = arith.constant 0 : i32
    %c0_i32_1 = arith.constant 0 : i32
    return %c0_i32, %c0_i32_0 : i32, i32
  }
  func.func @transform_5(%arg0: i32) -> (i32, i32) {
    %c0_i32 = arith.constant 0 : i32
    %c0_i32_0 = arith.constant 0 : i32
    %c0_i32_1 = arith.constant 0 : i32
    return %c0_i32, %c0_i32_0 : i32, i32
  }
  func.func @transform_6(%arg0: i32) -> (i32, i32) {
    %c0_i32 = arith.constant 0 : i32
    %c0_i32_0 = arith.constant 0 : i32
    return %arg0, %c0_i32 : i32, i32
  }
}

</mosaic_0001>

<bundles_post_ra>
// kernel: tpu_custom_call.1
= control target key start
LH: loop header
LB: loop body
LE: loop exit
PB: predicated region body
PF: predicated region fallthrough
CT: control target
= control target key end

     0   :  { %s2390_s0 = inlined_call_operand.vmem [shape: f32[256,32], index: 0, kind: input, shape index: {}]   ;;  %s2391_s1 = inlined_call_operand.vmem [shape: f32[2,128,128], index: 1, kind: input, shape index: {}]   ;;  %s2392_s2 = inlined_call_operand.vmem [shape: f32[32,32], index: 2, kind: input, shape index: {}]   ;;  %s2393_s3 = inlined_call_operand.vmem [shape: f32[32,32], index: 3, kind: input, shape index: {}]   ;;  %s2394_s4 = inlined_call_operand.hbm [shape: f32[8,32], index: 4, kind: input, shape index: {}]   ;;  %s2395_s5 = inlined_call_operand.<no memory space> [shape: f32[1,1], index: 5, kind: input, shape index: {}]   ;;  %s2396_s6 = inlined_call_operand.vmem [shape: f32[256,32], index: 6, kind: output, shape index: {}]  }
   0x1   :  { %11 = sst [smem:[#allocation2]] %s2395_s5 }
   0x2   :  { %12 = vsyncpa [#allocation4], 0  ;;  %s1788_s23 = smov 0  }
   0x3 LB: > { %s1794_s24 = sadd.s32 4294967295, %s1747_s23   ;;  %p1485_p0 = scmp.ge.s32.totalorder %s1747_s23, 1  ;;  %s1747_s23 = sphi %s1788_s23, %s18_s23  }
   0x4   : > { %p185_p1 = scmp.lt.s32.totalorder %s1747_s23, 3  ;;  %s203_s5 = sshll.u32 %s2394_s4, 4  ;;  %s204_s5 = int_to_ptr.hbm [resolvable:$true] %s203_s5 }
   0x5   : > { %p1579_p3 = scmp.eq.s32.totalorder %s1794_s24, 0  ;;  %s1749_s27 = smov [#allocation3]  }
   0x6   : > { %p186_p2 = pnand %p1485_p0, %p185_p1  ;;  %s205_s28 = sshll.u32 %s1749_s27, 4  ;;  %s206_s28 = int_to_ptr.vmem [resolvable:$true] %s205_s28 }
   0x8   : > { %p1575_p4 = pneg %p186_p2  ;;  %238 = sbr.rel (%p186_p2) target bundleno = 1055 (0x41f), region = 44 }
   0xa   : > { %p1576_p5 = pnand %p1579_p3, %p1575_p4 }
   0xc   : > { %1578 = dma.hbm_to_vmem [thread:$0]  (!%p1576_p5), %s204_s5, 128, %s206_s28, [#allocation4]  }
   0xd   : > { %1742 = dma.done.wait (%p1579_p3), [#allocation4], 128  }
   0xe   : > { %1744 = vsyncadd (%p1579_p3), [#allocation4], 4294967168  ;;  %s1490_s29 = sshll.u32 %s1794_s24, 4  ;;  %v329_v0 = vld [vmem:[%s2392_s2 + $0x18] sm:$0xff]  ;;  %v328_v1 = vld [vmem:[%s2392_s2 + $0x10] sm:$0xff]  ;;  %vm331_vm0 = vcmask 261120  }
   0xf   : > { %p275_p6 = scmp.lt.s32.totalorder %s1490_s29, 31  ;;  %392 = vmatpush.msra.mxu0 %v329_v0  ;;  %v327_v2 = vld [vmem:[%s2392_s2 + $0x8] sm:$0xff]  ;;  %v326_v3 = vld [vmem:[%s2392_s2] sm:$0xff]  ;;  %v448_v16 = vld [vmem:[%s2393_s3 + $0x18] sm:$0xff]  ;;  %p280_p7 = scmp.lt.s32.totalorder %s1794_s24, 1 }
  0x10   : > { %v447_v17 = vld [vmem:[%s2393_s3 + $0x10] sm:$0xff]  ;;  %509 = vmatpush.msra.mxu1 %v448_v16  ;;  %v446_v18 = vld [vmem:[%s2393_s3 + $0x8] sm:$0xff]  ;;  %v445_v20 = vld [vmem:[%s2393_s3] sm:$0xff] }
  0x11   : > { %s2401_s29 = smov (!%p275_p6, %s1490_s29), 31  ;;  %393 = vmatpush.msra.mxu0 %v328_v1  ;;  %v1591_v24 = vld [vmem:[#allocation3] ss:$0 sm:$0xff]  ;;  %s2403_s24 = smov (!%p280_p7, %s1794_s24), 1 }
  0x12   : > { %s1491_s30 = sshll.u32 %s2401_s29, 3  ;;  %510 = vmatpush.msra.mxu1 %v447_v17  ;;  %s1554_s27 = sshll.u32 %s2403_s24, 7 }
  0x13   : > { %s1820_s15 = scalar_lea.vmem %s2390_s0, %s1491_s30  ;;  %394 = vmatpush.msra.mxu0 %v327_v2  ;;  %s1966_s8 = scalar_lea.vmem %s2391_s1, %s1554_s27 }
  0x14   : > { %v1826_v4 = vld [vmem:[%s1820_s15] sm:$0xff]  ;;  %v1831_v5 = vld [vmem:[%s1820_s15 + $0x8] sm:$0xff]  ;;  %v1836_v6 = vld [vmem:[%s1820_s15 + $0x10] sm:$0xff]  ;;  %511 = vmatpush.msra.mxu1 %v446_v18  ;;  %s1001_s24 = sld [smem:[#allocation2]]  ;;  %s2285_s11 = scalar_lea.vmem %s2396_s6, %s1491_s30 }
  0x15   : > { %395 = vmatpush.msra.mxu0 %v326_v3  ;;  %v1841_v7 = vld [vmem:[%s1820_s15 + $0x18] sm:$0xff]  ;;  %v1846_v8 = vld [vmem:[%s1820_s15 + $0x20] sm:$0xff]  ;;  %v1851_v9 = vld [vmem:[%s1820_s15 + $0x28] sm:$0xff] }
  0x16   : > { %1496 = vmatmul.msk.f32.vlgmr.msra.gmra.mxu0 %vm331_vm0, %v1826_v4  ;;  %v1856_v10 = vld [vmem:[%s1820_s15 + $0x30] sm:$0xff]  ;;  %v1861_v11 = vld [vmem:[%s1820_s15 + $0x38] sm:$0xff]  ;;  %v1866_v12 = vld [vmem:[%s1820_s15 + $0x40] sm:$0xff]  ;;  %512 = vmatpush.msra.mxu1 %v445_v20 }
  0x17   : > { %v1871_v13 = vld [vmem:[%s1820_s15 + $0x48] sm:$0xff]  ;;  %v1876_v14 = vld [vmem:[%s1820_s15 + $0x50] sm:$0xff]  ;;  %v1881_v15 = vld [vmem:[%s1820_s15 + $0x58] sm:$0xff] }
  0x18   : > { %v1895_v19 = vld [vmem:[%s1820_s15 + $0x60] sm:$0xff]  ;;  %v1903_v21 = vld [vmem:[%s1820_s15 + $0x68] sm:$0xff]  ;;  %v1908_v22 = vld [vmem:[%s1820_s15 + $0x70] sm:$0xff] }
  0x19   : > { %v1913_v23 = vld [vmem:[%s1820_s15 + $0x78] sm:$0xff] }
  0x1a   : > { %2398 = vst [vmem:[#allocation6_spill] sm:$0xff] %v1913_v23 }
  0x1e   : > { %1497 = vmatmul.msk.f32.gmra.mxu0 %vm331_vm0, %v1831_v5 }
  0x26   : > { %1498 = vmatmul.msk.f32.gmra.mxu0 %vm331_vm0, %v1836_v6 }
  0x2e   : > { %1499 = vmatmul.msk.f32.gmra.mxu0 %vm331_vm0, %v1841_v7 }
  0x36   : > { %1500 = vmatmul.msk.f32.gmra.mxu0 %vm331_vm0, %v1846_v8 }
  0x3e   : > { %1501 = vmatmul.msk.f32.gmra.mxu0 %vm331_vm0, %v1851_v9 }
  0x46   : > { %1502 = vmatmul.msk.f32.gmra.mxu0 %vm331_vm0, %v1856_v10 }
  0x4e   : > { %1503 = vmatmul.msk.f32.gmra.mxu0 %vm331_vm0, %v1861_v11 }
  0x56   : > { %1504 = vmatmul.msk.f32.gmra.mxu0 %vm331_vm0, %v1866_v12 }
  0x5e   : > { %1505 = vmatmul.msk.f32.gmra.mxu0 %vm331_vm0, %v1871_v13 }
  0x66   : > { %1506 = vmatmul.msk.f32.gmra.mxu0 %vm331_vm0, %v1876_v14 }
  0x6e   : > { %1507 = vmatmul.msk.f32.gmra.mxu0 %vm331_vm0, %v1881_v15 }
  0x76   : > { %1508 = vmatmul.msk.f32.gmra.mxu0 %vm331_vm0, %v1895_v19 }
  0x7e   : > { %1509 = vmatmul.msk.f32.gmra.mxu0 %vm331_vm0, %v1903_v21 }
  0x86   : > { %1510 = vmatmul.msk.f32.gmra.mxu0 %vm331_vm0, %v1908_v22 }
  0x8e   : > { %1511 = vmatmul.msk.f32.gmra.mxu0 %vm331_vm0, %v1913_v23 }
  0x93   : > { %v397_v25 = vpop.f32.mrf.mxu0 }
  0x94   : > { %v398_v26 = vadd.f32 %v1591_v24, %v397_v25 }
  0x96   : > { %1512 = vmatmul.msk.f32.vlgmr.msra.gmra.mxu1 %vm331_vm0, %v398_v26 }
  0x9b   : > { %v400_v27 = vpop.f32.mrf.mxu0 }
  0x9c   : > { %v401_v28 = vadd.f32 %v1591_v24, %v400_v27 }
  0x9e   : > { %1513 = vmatmul.msk.f32.gmra.mxu1 %vm331_vm0, %v401_v28  ;;  %v1919_v29 = vpack.c.bf16 %v401_v28, %v398_v26 }
  0xa3   : > { %v403_v30 = vpop.f32.mrf.mxu0 }
  0xa4   : > { %v404_v31 = vadd.f32 %v1591_v24, %v403_v30 }
  0xa6   : > { %1514 = vmatmul.msk.f32.gmra.mxu1 %vm331_vm0, %v404_v31 }
  0xab   : > { %v406_v32 = vpop.f32.mrf.mxu0 }
  0xac   : > { %v407_v33 = vadd.f32 %v1591_v24, %v406_v32  ;;  %v603_v32 = vsel %vm331_vm0, %v1919_v29, 0 }
  0xae   : > { %1515 = vmatmul.msk.f32.gmra.mxu1 %vm331_vm0, %v407_v33  ;;  %v1923_v34 = vpack.c.bf16 %v407_v33, %v404_v31 }
  0xb0   : > { %v606_v30 = vsel %vm331_vm0, %v1923_v34, 0 }
  0xb3   : > { %v409_v35 = vpop.f32.mrf.mxu0 }
  0xb4   : > { %v410_v36 = vadd.f32 %v1591_v24, %v409_v35 }
  0xb6   : > { %1516 = vmatmul.msk.f32.gmra.mxu1 %vm331_vm0, %v410_v36 }
  0xbb   : > { %v412_v37 = vpop.f32.mrf.mxu0 }
  0xbc   : > { %v413_v38 = vadd.f32 %v1591_v24, %v412_v37 }
  0xbe   : > { %1517 = vmatmul.msk.f32.gmra.mxu1 %vm331_vm0, %v413_v38  ;;  %v1927_v39 = vpack.c.bf16 %v413_v38, %v410_v36 }
  0xc0   : > { %v609_v27 = vsel %vm331_vm0, %v1927_v39, 0 }
  0xc3   : > { %v415_v40 = vpop.f32.mrf.mxu0 }
  0xc4   : > { %v416_v41 = vadd.f32 %v1591_v24, %v415_v40 }
  0xc6   : > { %1518 = vmatmul.msk.f32.gmra.mxu1 %vm331_vm0, %v416_v41 }
  0xcb   : > { %v418_v42 = vpop.f32.mrf.mxu0 }
  0xcc   : > { %v419_v43 = vadd.f32 %v1591_v24, %v418_v42 }
  0xce   : > { %1519 = vmatmul.msk.f32.gmra.mxu1 %vm331_vm0, %v419_v43  ;;  %v565_v44 = vpack.c.bf16 %v419_v43, %v416_v41 }
  0xd0   : > { %v612_v25 = vsel %vm331_vm0, %v565_v44, 0 }
  0xd3   : > { %v421_v45 = vpop.f32.mrf.mxu0 }
  0xd4   : > { %v422_v46 = vadd.f32 %v1591_v24, %v421_v45 }
  0xd6   : > { %1520 = vmatmul.msk.f32.gmra.mxu1 %vm331_vm0, %v422_v46 }
  0xdb   : > { %v424_v47 = vpop.f32.mrf.mxu0 }
  0xdc   : > { %v425_v48 = vadd.f32 %v1591_v24, %v424_v47 }
  0xde   : > { %1521 = vmatmul.msk.f32.gmra.mxu1 %vm331_vm0, %v425_v48  ;;  %v566_v3 = vpack.c.bf16 %v425_v48, %v422_v46 }
  0xe0   : > { %v615_v20 = vsel %vm331_vm0, %v566_v3, 0 }
  0xe3   : > { %v427_v49 = vpop.f32.mrf.mxu0 }
  0xe4   : > { %v428_v50 = vadd.f32 %v1591_v24, %v427_v49 }
  0xe6   : > { %1522 = vmatmul.msk.f32.gmra.mxu1 %vm331_vm0, %v428_v50 }
  0xeb   : > { %v430_v51 = vpop.f32.mrf.mxu0 }
  0xec   : > { %v431_v52 = vadd.f32 %v1591_v24, %v430_v51 }
  0xee   : > { %1523 = vmatmul.msk.f32.gmra.mxu1 %vm331_vm0, %v431_v52  ;;  %v567_v1 = vpack.c.bf16 %v431_v52, %v428_v50 }
  0xf0   : > { %v618_v17 = vsel %vm331_vm0, %v567_v1, 0 }
  0xf3   : > { %v433_v53 = vpop.f32.mrf.mxu0 }
  0xf4   : > { %v434_v54 = vadd.f32 %v1591_v24, %v433_v53 }
  0xf6   : > { %1524 = vmatmul.msk.f32.gmra.mxu1 %vm331_vm0, %v434_v54 }
  0xfb   : > { %v436_v55 = vpop.f32.mrf.mxu0 }
  0xfc   : > { %v437_v56 = vadd.f32 %v1591_v24, %v436_v55 }
  0xfe   : > { %1525 = vmatmul.msk.f32.gmra.mxu1 %vm331_vm0, %v437_v56  ;;  %v568_v63 = vpack.c.bf16 %v437_v56, %v434_v54 }
 0x100   : > { %v621_v2 = vsel %vm331_vm0, %v568_v63, 0 }
 0x103   : > { %v439_v57 = vpop.f32.mrf.mxu0 }
 0x104   : > { %v440_v58 = vadd.f32 %v1591_v24, %v439_v57 }
 0x106   : > { %1526 = vmatmul.msk.f32.gmra.mxu1 %vm331_vm0, %v440_v58 }
 0x10b   : > { %v442_v59 = vpop.f32.mrf.mxu0 }
 0x10c   : > { %v443_v60 = vadd.f32 %v1591_v24, %v442_v59  ;;  %v1972_v59 = vld [vmem:[%s1966_s8 + $0x28] sm:$0xff] }
 0x10d   : > { %vm680_vm2 = vcmp.gt.f32.partialorder %v1972_v59, 0.0 }
 0x10e   : > { %1527 = vmatmul.msk.f32.gmra.mxu1 %vm331_vm0, %v443_v60  ;;  %v569_v61 = vpack.c.bf16 %v443_v60, %v440_v58  ;;  %v1969_v58 = vld [vmem:[%s1966_s8 + $0x20] sm:$0xff] }
 0x10f   : > { %v1975_v60 = vld [vmem:[%s1966_s8] sm:$0xff]  ;;  %vm679_vm1 = vcmp.gt.f32.partialorder %v1969_v58, 0.0 }
 0x110   : > { %838 = vmatpush.bf16.msra.mxu3 %v569_v61  ;;  %v624_v62 = vsel %vm331_vm0, %v569_v61, 0  ;;  %v1978_v61 = vld [vmem:[%s1966_s8 + $0x8] sm:$0xff]  ;;  %vm675_vm3 = vcmp.gt.f32.partialorder %v1975_v60, 0.0 }
 0x111   : > { %626 = vmatpush.bf16.xpose.msrb.mxu0 %v624_v62  ;;  %1555 = vmatpush.bf16.xpose.msrb.mxu1 %v624_v62  ;;  %vm676_vm4 = vcmp.gt.f32.partialorder %v1978_v61, 0.0 }
 0x112   : > { %1556 = vmatpush.bf16.xpose.msra.mxu2 %v624_v62  ;;  %v1981_v62 = vld [vmem:[%s1966_s8 + $0x40] sm:$0xff] }
 0x113   : > { %v514_v0 = vpop.f32.mrf.mxu1  ;;  %vm683_vm5 = vcmp.gt.f32.partialorder %v1981_v62, 0.0 }
 0x114   : > { %839 = vmatpush.bf16.msra.mxu3 %v568_v63  ;;  %v1984_v63 = vld [vmem:[%s1966_s8 + $0x48] sm:$0xff] }
 0x115   : > { %vm684_vm6 = vcmp.gt.f32.partialorder %v1984_v63, 0.0 }
 0x118   : > { %840 = vmatpush.bf16.msra.mxu3 %v567_v1  ;;  %v1990_v1 = vld [vmem:[%s1966_s8 + $0x60] sm:$0xff] }
 0x119   : > { %627 = vmatpush.bf16.xpose.msrb.mxu0 %v621_v2  ;;  %1557 = vmatpush.bf16.xpose.msrb.mxu1 %v621_v2  ;;  %vm687_vm7 = vcmp.gt.f32.partialorder %v1990_v1, 0.0 }
 0x11a   : > { %1558 = vmatpush.bf16.xpose.msra.mxu2 %v621_v2 }
 0x11b   : > { %v517_v16 = vpop.f32.mrf.mxu1 }
 0x11c   : > { %841 = vmatpush.bf16.msra.mxu3 %v566_v3  ;;  %v570_v35 = vpack.c.bf16 %v517_v16, %v514_v0 }
 0x120   : > { %842 = vmatpush.bf16.msra.mxu3 %v565_v44 }
 0x121   : > { %628 = vmatpush.bf16.xpose.msrb.mxu0 %v618_v17  ;;  %1559 = vmatpush.bf16.xpose.msrb.mxu1 %v618_v17 }
 0x122   : > { %1560 = vmatpush.bf16.xpose.msra.mxu2 %v618_v17  ;;  %v2000_v17 = vld [vmem:[%s1966_s8 + $0x68] sm:$0xff] }
 0x123   : > { %v520_v18 = vpop.f32.mrf.mxu1  ;;  %vm688_vm8 = vcmp.gt.f32.partialorder %v2000_v17, 0.0 }
 0x124   : > { %843 = vmatpush.bf16.msra.mxu3 %v1927_v39 }
 0x128   : > { %844 = vmatpush.bf16.msra.mxu3 %v1923_v34 }
 0x129   : > { %629 = vmatpush.bf16.xpose.msrb.mxu0 %v615_v20  ;;  %1561 = vmatpush.bf16.xpose.msrb.mxu1 %v615_v20 }
 0x12a   : > { %1562 = vmatpush.bf16.xpose.msra.mxu2 %v615_v20 }
 0x12b   : > { %v523_v24 = vpop.f32.mrf.mxu1 }
 0x12c   : > { %845 = vmatpush.bf16.msra.mxu3 %v1919_v29  ;;  %v571_v36 = vpack.c.bf16 %v523_v24, %v520_v18 }
 0x131   : > { %630 = vmatpush.bf16.xpose.msrb.mxu0 %v612_v25  ;;  %1563 = vmatpush.bf16.xpose.msrb.mxu1 %v612_v25 }
 0x132   : > { %1564 = vmatpush.bf16.xpose.msra.mxu2 %v612_v25 }
 0x133   : > { %v526_v26 = vpop.f32.mrf.mxu1 }
 0x139   : > { %631 = vmatpush.bf16.xpose.msrb.mxu0 %v609_v27  ;;  %1565 = vmatpush.bf16.xpose.msrb.mxu1 %v609_v27 }
 0x13a   : > { %1566 = vmatpush.bf16.xpose.msra.mxu2 %v609_v27 }
 0x13b   : > { %v529_v28 = vpop.f32.mrf.mxu1 }
 0x13c   : > { %v572_v37 = vpack.c.bf16 %v529_v28, %v526_v26 }
 0x141   : > { %632 = vmatpush.bf16.xpose.msrb.mxu0 %v606_v30  ;;  %1567 = vmatpush.bf16.xpose.msrb.mxu1 %v606_v30 }
 0x142   : > { %1568 = vmatpush.bf16.xpose.msra.mxu2 %v606_v30 }
 0x143   : > { %v532_v31 = vpop.f32.mrf.mxu1 }
 0x149   : > { %633 = vmatpush.bf16.xpose.msrb.mxu0 %v603_v32  ;;  %1569 = vmatpush.bf16.xpose.msrb.mxu1 %v603_v32 }
 0x14a   : > { %1570 = vmatpush.bf16.xpose.msra.mxu2 %v603_v32 }
 0x14b   : > { %v535_v33 = vpop.f32.mrf.mxu1 }
 0x14c   : > { %v573_v38 = vpack.c.bf16 %v535_v33, %v532_v31 }
 0x150   : > { %1528 = vmatmul.msk.bf16.vlgmr.msrb.gmra.mxu0 %vm331_vm0, %v570_v35  ;;  %1529 = vmatmul.msk.bf16.vlgmr.msrb.gmra.mxu1 %vm331_vm0, %v571_v36 }
 0x151   : > { %1530 = vmatmul.msk.bf16.vlgmr.msra.gmra.mxu2 %vm331_vm0, %v572_v37 }
 0x153   : > { %v538_v34 = vpop.f32.mrf.mxu1 }
 0x15b   : > { %v541_v39 = vpop.f32.mrf.mxu1 }
 0x15c   : > { %v574_v29 = vpack.c.bf16 %v541_v39, %v538_v34  ;;  %v2028_v39 = vld [vmem:[%s1966_s8 + $0x38] sm:$0xff] }
 0x15d   : > { %vm682_vm10 = vcmp.gt.f32.partialorder %v2028_v39, 0.0 }
 0x161   : > { %1531 = vmatmul.msk.bf16.gmra.mxu2 %vm331_vm0, %v573_v38  ;;  %v2025_v38 = vld [vmem:[%s1966_s8 + $0x30] sm:$0xff] }
 0x162   : > { %vm681_vm9 = vcmp.gt.f32.partialorder %v2025_v38, 0.0 }
 0x163   : > { %v544_v40 = vpop.f32.mrf.mxu1 }
 0x16b   : > { %v547_v41 = vpop.f32.mrf.mxu1 }
 0x16c   : > { %v575_v43 = vpack.c.bf16 %v547_v41, %v544_v40  ;;  %v2031_v40 = vld [vmem:[%s1966_s8 + $0x10] sm:$0xff] }
 0x16d   : > { %v2037_v41 = vld [vmem:[%s1966_s8 + $0x50] sm:$0xff]  ;;  %vm677_vm11 = vcmp.gt.f32.partialorder %v2031_v40, 0.0 }
 0x16e   : > { %vm685_vm13 = vcmp.gt.f32.partialorder %v2037_v41, 0.0 }
 0x171   : > { %1532 = vmatmul.msk.bf16.gmra.mxu2 %vm331_vm0, %v574_v29  ;;  %v2034_v29 = vld [vmem:[%s1966_s8 + $0x18] sm:$0xff] }
 0x172   : > { %vm678_vm12 = vcmp.gt.f32.partialorder %v2034_v29, 0.0 }
 0x173   : > { %v550_v42 = vpop.f32.mrf.mxu1 }
 0x17b   : > { %v553_v44 = vpop.f32.mrf.mxu1 }
 0x17c   : > { %v576_v45 = vpack.c.bf16 %v553_v44, %v550_v42  ;;  %v2040_v42 = vld [vmem:[%s1966_s8 + $0x58] sm:$0xff]  ;;  %v2046_v44 = vld [vmem:[%s1966_s8 + $0x70] sm:$0xff] }
 0x17d   : > { %vm686_vm14 = vcmp.gt.f32.partialorder %v2040_v42, 0.0  ;;  %vm689_vm15 = vcmp.gt.f32.partialorder %v2046_v44, 0.0 }
 0x181   : > { %1533 = vmatmul.msk.bf16.gmra.mxu2 %vm331_vm0, %v575_v43 }
 0x183   : > { %v556_v46 = vpop.f32.mrf.mxu1 }
 0x18b   : > { %v559_v47 = vpop.f32.mrf.mxu1 }
 0x18c   : > { %v577_v48 = vpack.c.bf16 %v559_v47, %v556_v46 }
 0x191   : > { %1534 = vmatmul.msk.bf16.gmra.mxu2 %vm331_vm0, %v576_v45 }
 0x1a1   : > { %1535 = vmatmul.msk.bf16.gmra.mxu2 %vm331_vm0, %v577_v48  ;;  %v2052_v48 = vld [vmem:[%s1966_s8 + $0x78] sm:$0xff] }
 0x1cd   : > { %v635_v56 = vpop.f32.mrf.mxu0  ;;  %v640_v30 = vpop.f32.mrf.mxu1 }
 0x1ce   : > { %v2002_v18 = vsel %vm675_vm3, %v635_v56, -9e+15 }
 0x1d4   : > { %v645_v49 = vpop.f32.mrf.mxu2 }
 0x1d5   : > { %v637_v2 = vpop.f32.mrf.mxu0  ;;  %v1995_v3 = vsel %vm679_vm1, %v645_v49, -9e+15  ;;  %v642_v45 = vpop.f32.mrf.mxu1  ;;  %v693_v49 = vsel %vm677_vm11, %v640_v30, -9e+15  ;;  %vm690_vm1 = vcmp.gt.f32.partialorder %v2052_v48, 0.0 }
 0x1d6   : > { %v2005_v20 = vsel %vm676_vm4, %v637_v2, -9e+15  ;;  %v707_v26 = vmax.f32 %v2002_v18, %v1995_v3 }
 0x1dc   : > { %v647_v50 = vpop.f32.mrf.mxu2 }
 0x1dd   : > { %v1997_v16 = vsel %vm680_vm2, %v647_v50, -9e+15  ;;  %v694_v50 = vsel %vm678_vm12, %v642_v45, -9e+15 }
 0x1de   : > { %v708_v27 = vmax.f32 %v2005_v20, %v1997_v16 }
 0x1e4   : > { %v650_v51 = vpop.f32.mrf.mxu2 }
 0x1e5   : > { %v697_v46 = vsel %vm681_vm9, %v650_v51, -9e+15 }
 0x1e6   : > { %v709_v56 = vmax.f32 %v693_v49, %v697_v46 }
 0x1ec   : > { %v652_v52 = vpop.f32.mrf.mxu2 }
 0x1ed   : > { %v698_v47 = vsel %vm682_vm10, %v652_v52, -9e+15 }
 0x1f4   : > { %v655_v53 = vpop.f32.mrf.mxu2 }
 0x1f5   : > { %v2007_v24 = vsel %vm683_vm5, %v655_v53, -9e+15 }
 0x1f6   : > { %v711_v31 = vmax.f32 %v707_v26, %v2007_v24 }
 0x1fc   : > { %v657_v54 = vpop.f32.mrf.mxu2 }
 0x1fd   : > { %v2009_v25 = vsel %vm684_vm6, %v657_v54, -9e+15 }
 0x1fe   : > { %v712_v32 = vmax.f32 %v708_v27, %v2009_v25 }
 0x204   : > { %v660_v55 = vpop.f32.mrf.mxu2 }
 0x205   : > { %v701_v53 = vsel %vm685_vm13, %v660_v55, -9e+15 }
 0x206   : > { %v713_v26 = vmax.f32 %v709_v56, %v701_v53 }
 0x20c   : > { %v662_v57 = vpop.f32.mrf.mxu2 }
 0x20d   : > { %v2055_v54 = vsel %vm686_vm14, %v662_v57, -9e+15 }
 0x214   : > { %v665_v0 = vpop.f32.mrf.mxu2 }
 0x215   : > { %v2016_v28 = vsel %vm687_vm7, %v665_v0, -9e+15  ;;  %v710_v0 = vmax.f32 %v694_v50, %v698_v47 }
 0x216   : > { %v715_v36 = vmax.f32 %v711_v31, %v2016_v28 }
 0x217   : > { %v714_v27 = vmax.f32 %v710_v0, %v2055_v54 }
 0x21c   : > { %v667_v33 = vpop.f32.mrf.mxu2 }
 0x21d   : > { %v2020_v35 = vsel %vm688_vm8, %v667_v33, -9e+15 }
 0x21e   : > { %v716_v37 = vmax.f32 %v712_v32, %v2020_v35 }
 0x220   : > { %v719_v34 = vmax.f32 %v715_v36, %v716_v37 }
 0x224   : > { %v670_v43 = vpop.f32.mrf.mxu2 }
 0x225   : > { %v2058_v2 = vsel %vm689_vm15, %v670_v43, -9e+15 }
 0x226   : > { %v717_v30 = vmax.f32 %v713_v26, %v2058_v2 }
 0x22c   : > { %v672_v51 = vpop.f32.mrf.mxu2 }
 0x22d   : > { %v2061_v52 = vsel %vm690_vm1, %v672_v51, -9e+15 }
 0x22e   : > { %v718_v31 = vmax.f32 %v714_v27, %v2061_v52 }
 0x230   : > { %v720_v32 = vmax.f32 %v717_v30, %v718_v31 }
 0x232   : > { %v721_v55 = vmax.f32 %v719_v34, %v720_v32 }
 0x234   : > { %v722_v57 = vrot.slane %v721_v55, 4 }
 0x236   : > { %v723_v33 = vmax.f32 %v721_v55, %v722_v57 }
 0x238   : > { %v724_v36 = vrot.slane %v723_v33, 2 }
 0x23a   : > { %v725_v37 = vmax.f32 %v723_v33, %v724_v36 }
 0x23c   : > { %v726_v45 = vrot.slane %v725_v37, 1 }
 0x23e   : > { %v2065_v23 = vmax.f32 %v725_v37, %v726_v45 }
 0x240   : > { %v728_v43 = vsub.f32 %v2002_v18, %v2065_v23  ;;  %v729_v56 = vsub.f32 %v2005_v20, %v2065_v23  ;;  %v730_v0 = vsub.f32 %v693_v49, %v2065_v23  ;;  %v732_v26 = vsub.f32 %v1995_v3, %v2065_v23 }
 0x241   : > { %v733_v34 = vsub.f32 %v1997_v16, %v2065_v23  ;;  %v734_v27 = vsub.f32 %v697_v46, %v2065_v23  ;;  %v731_v51 = vsub.f32 %v694_v50, %v2065_v23  ;;  %v735_v49 = vsub.f32 %v698_v47, %v2065_v23 }
 0x242   : > { %v744_v30 = vmul.f32 1.442695, %v728_v43  ;;  %v746_v31 = vmul.f32 1.442695, %v729_v56  ;;  %v748_v32 = vmul.f32 1.442695, %v730_v0  ;;  %v736_v16 = vsub.f32 %v2007_v24, %v2065_v23 }
 0x243   : > { %v750_v18 = vmul.f32 1.442695, %v731_v51  ;;  %v752_v20 = vmul.f32 1.442695, %v732_v26  ;;  %v754_v55 = vmul.f32 1.442695, %v733_v34  ;;  %v737_v36 = vsub.f32 %v2009_v25, %v2065_v23 }
 0x244   : > { %1593 = vpow2.f32 %v744_v30  ;;  %v756_v46 = vmul.f32 1.442695, %v734_v27  ;;  %v758_v47 = vmul.f32 1.442695, %v735_v49  ;;  %v738_v43 = vsub.f32 %v701_v53, %v2065_v23 }
 0x245   : > { %1595 = vpow2.f32 %v746_v31  ;;  %v760_v56 = vmul.f32 1.442695, %v736_v16  ;;  %v739_v26 = vsub.f32 %v2055_v54, %v2065_v23  ;;  %v762_v34 = vmul.f32 1.442695, %v737_v36 }
 0x246   : > { %1597 = vpow2.f32 %v748_v32  ;;  %v740_v25 = vsub.f32 %v2016_v28, %v2065_v23  ;;  %v764_v30 = vmul.f32 1.442695, %v738_v43  ;;  %v741_v53 = vsub.f32 %v2020_v35, %v2065_v23 }
 0x247   : > { %1599 = vpow2.f32 %v750_v18  ;;  %v766_v18 = vmul.f32 1.442695, %v739_v26  ;;  %v742_v54 = vsub.f32 %v2058_v2, %v2065_v23  ;;  %v743_v28 = vsub.f32 %v2061_v52, %v2065_v23 }
 0x248   : > { %1601 = vpow2.f32 %v752_v20 }
 0x249   : > { %1603 = vpow2.f32 %v754_v55  ;;  %v768_v55 = vmul.f32 1.442695, %v740_v25  ;;  %v772_v35 = vmul.f32 1.442695, %v742_v54 }
 0x24a   : > { %v2079_v3 = vpop.eup %1593  ;;  %1605 = vpow2.f32 %v756_v46 }
 0x24b   : > { %v2081_v57 = vpop.eup %1595  ;;  %1607 = vpow2.f32 %v758_v47 }
 0x24c   : > { %v776_v50 = vadd.f32 %v2081_v57, %v2079_v3  ;;  %v2087_v33 = vpop.eup %1597  ;;  %1609 = vpow2.f32 %v760_v56  ;;  %v774_v56 = vmul.f32 1.442695, %v743_v28 }
 0x24d   : > { %v1600_v45 = vpop.eup %1599  ;;  %1611 = vpow2.f32 %v762_v34 }
 0x24e   : > { %v777_v37 = vadd.f32 %v2087_v33, %v776_v50  ;;  %v1602_v0 = vpop.eup %1601  ;;  %1613 = vpow2.f32 %v764_v30  ;;  %v770_v50 = vmul.f32 1.442695, %v741_v53 }
 0x24f   : > { %v1604_v51 = vpop.eup %1603  ;;  %1615 = vpow2.f32 %v766_v18 }
 0x250   : > { %v778_v24 = vadd.f32 %v1600_v45, %v777_v37  ;;  %v1606_v32 = vpop.eup %1605  ;;  %1617 = vpow2.f32 %v768_v55 }
 0x251   : > { %v1608_v49 = vpop.eup %1607  ;;  %1619 = vpow2.f32 %v770_v50 }
 0x252   : > { %v779_v27 = vadd.f32 %v1602_v0, %v778_v24  ;;  %v1610_v46 = vpop.eup %1609  ;;  %1621 = vpow2.f32 %v772_v35 }
 0x253   : > { %v1612_v47 = vpop.eup %1611  ;;  %1623 = vpow2.f32 %v774_v56 }
 0x254   : > { %v780_v31 = vadd.f32 %v1604_v51, %v779_v27  ;;  %v1614_v43 = vpop.eup %1613 }
 0x255   : > { %v1616_v26 = vpop.eup %1615 }
 0x256   : > { %v781_v20 = vadd.f32 %v1606_v32, %v780_v31  ;;  %v1618_v34 = vpop.eup %1617 }
 0x257   : > { %v1620_v25 = vpop.eup %1619 }
 0x258   : > { %v782_v16 = vadd.f32 %v1608_v49, %v781_v20  ;;  %v1622_v23 = vpop.eup %1621 }
 0x259   : > { %v1624_v31 = vpop.eup %1623 }
 0x25a   : > { %v783_v36 = vadd.f32 %v1610_v46, %v782_v16 }
 0x25c   : > { %v784_v37 = vadd.f32 %v1612_v47, %v783_v36 }
 0x25e   : > { %v785_v24 = vadd.f32 %v1614_v43, %v784_v37 }
 0x260   : > { %v786_v2 = vadd.f32 %v1616_v26, %v785_v24 }
 0x262   : > { %v787_v27 = vadd.f32 %v1618_v34, %v786_v2 }
 0x264   : > { %v788_v30 = vadd.f32 %v1620_v25, %v787_v27 }
 0x266   : > { %v789_v52 = vadd.f32 %v1622_v23, %v788_v30 }
 0x268   : > { %v790_v53 = vadd.f32 %v1624_v31, %v789_v52 }
 0x26a   : > { %v791_v18 = vrot.slane %v790_v53, 4 }
 0x26c   : > { %v792_v20 = vadd.f32 %v791_v18, %v790_v53 }
 0x26e   : > { %v793_v54 = vrot.slane %v792_v20, 2 }
 0x270   : > { %v794_v55 = vadd.f32 %v793_v54, %v792_v20 }
 0x272   : > { %v795_v16 = vrot.slane %v794_v55, 1 }
 0x274   : > { %v796_v50 = vadd.f32 %v795_v16, %v794_v55 }
 0x276   : > { %1625 = vrcp.f32 %v796_v50 }
 0x27c   : > { %v1626_v28 = vpop.eup %1625 }
 0x27d   : > { %v798_v36 = vmul.f32 %v1626_v28, %v2079_v3  ;;  %v799_v35 = vmul.f32 %v1626_v28, %v2081_v57  ;;  %v800_v37 = vmul.f32 %v1626_v28, %v2087_v33  ;;  %v801_v56 = vmul.f32 %v1626_v28, %v1600_v45 }
 0x27e   : > { %v802_v24 = vmul.f32 %v1626_v28, %v1602_v0  ;;  %v803_v2 = vmul.f32 %v1626_v28, %v1604_v51  ;;  %v804_v27 = vmul.f32 %v1626_v28, %v1606_v32  ;;  %v805_v30 = vmul.f32 %v1626_v28, %v1608_v49 }
 0x27f   : > { %v814_v52 = vmul.f32 %v798_v36, %v1975_v60  ;;  %v815_v53 = vmul.f32 %v799_v35, %v1978_v61  ;;  %v816_v18 = vmul.f32 %v800_v37, %v2031_v40  ;;  %v817_v20 = vmul.f32 %v801_v56, %v2034_v29 }
 0x280   : > { %v818_v54 = vmul.f32 %v802_v24, %v1969_v58  ;;  %v819_v3 = vmul.f32 %v803_v2, %v1972_v59  ;;  %v820_v57 = vmul.f32 %v804_v27, %v2025_v38  ;;  %v821_v33 = vmul.f32 %v805_v30, %v2028_v39 }
 0x281   : > { %v830_v45 = vpack.c.bf16 %v815_v53, %v814_v52  ;;  %v831_v0 = vpack.c.bf16 %v817_v20, %v816_v18  ;;  %v806_v51 = vmul.f32 %v1626_v28, %v1610_v46  ;;  %v807_v32 = vmul.f32 %v1626_v28, %v1612_v47 }
 0x282   : > { %v832_v49 = vpack.c.bf16 %v819_v3, %v818_v54  ;;  %v833_v60 = vpack.c.bf16 %v821_v33, %v820_v57  ;;  %v808_v55 = vmul.f32 %v1626_v28, %v1614_v43  ;;  %v809_v61 = vmul.f32 %v1626_v28, %v1616_v26 }
 0x283   : > { %846 = vmatmul.bf16.vlgmr.msra.gmra.mxu3 %v830_v45  ;;  %v822_v40 = vmul.f32 %v806_v51, %v1981_v62  ;;  %v823_v29 = vmul.f32 %v807_v32, %v1984_v63  ;;  %v810_v58 = vmul.f32 %v1626_v28, %v1618_v34  ;;  %v811_v16 = vmul.f32 %v1626_v28, %v1620_v25 }
 0x284   : > { %v824_v59 = vmul.f32 %v808_v55, %v2037_v41  ;;  %v825_v38 = vmul.f32 %v809_v61, %v2040_v42  ;;  %v812_v39 = vmul.f32 %v1626_v28, %v1622_v23  ;;  %v813_v50 = vmul.f32 %v1626_v28, %v1624_v31  ;;  %v2122_v41 = vld [vmem:[#allocation3 + $0x1] ss:$0 sm:$0xff]  ;;  %v2124_v42 = vld [vmem:[#allocation3 + $0x2] ss:$0 sm:$0xff] }
 0x285   : > { %v834_v36 = vpack.c.bf16 %v823_v29, %v822_v40  ;;  %v826_v46 = vmul.f32 %v810_v58, %v1990_v1  ;;  %v827_v47 = vmul.f32 %v811_v16, %v2000_v17  ;;  %v905_v31 = vmul.f32 %v2122_v41, %v1831_v5 }
 0x286   : > { %v835_v43 = vpack.c.bf16 %v825_v38, %v824_v59  ;;  %v828_v26 = vmul.f32 %v812_v39, %v2046_v44  ;;  %v829_v62 = vmul.f32 %v813_v50, %v2052_v48  ;;  %v904_v44 = vmul.f32 %v2122_v41, %v1826_v4 }
 0x287   : > { %v836_v35 = vpack.c.bf16 %v827_v47, %v826_v46  ;;  %v906_v27 = vmul.f32 %v2122_v41, %v1836_v6  ;;  %v907_v18 = vmul.f32 %v2122_v41, %v1841_v7  ;;  %v908_v45 = vmul.f32 %v2122_v41, %v1846_v8 }
 0x288   : > { %v837_v63 = vpack.c.bf16 %v829_v62, %v828_v26  ;;  %v910_v29 = vmul.f32 %v2122_v41, %v1856_v10  ;;  %v911_v39 = vmul.f32 %v2122_v41, %v1861_v11 }
 0x293   : > { %851 = vmatmul.bf16.gmra.mxu3 %v831_v0 }
 0x2a3   : > { %856 = vmatmul.bf16.gmra.mxu3 %v832_v49  ;;  %v909_v49 = vmul.f32 %v2122_v41, %v1851_v9 }
 0x2b3   : > { %861 = vmatmul.bf16.gmra.mxu3 %v833_v60 }
 0x2c3   : > { %866 = vmatmul.bf16.gmra.mxu3 %v834_v36 }
 0x2d3   : > { %871 = vmatmul.bf16.gmra.mxu3 %v835_v43  ;;  %v912_v43 = vmul.f32 %v2122_v41, %v1866_v12 }
 0x2e3   : > { %876 = vmatmul.bf16.gmra.mxu3 %v836_v35 }
 0x2f3   : > { %881 = vmatmul.bf16.gmra.mxu3 %v837_v63 }
 0x306   : > { %v2126_v1 = vpop.f32.mrf.mxu3 }
 0x307   : > { %v887_v17 = vmax.f32 %v2126_v1, 0.0 }
 0x309   : > { %v921_v48 = vmul.f32 %v2124_v42, %v887_v17 }
 0x30b   : > { %v937_v34 = vadd.f32 %v921_v48, %v904_v44  ;;  %v913_v44 = vmul.f32 %v2122_v41, %v1871_v13 }
 0x30d   : > { %v953_v25 = vsel %vm331_vm0, %v937_v34, 0.0 }
 0x30e   : > { %954 = vadd.xlane.f32.xlu0 %v953_v25  ;;  %v2135_v23 = vpop.f32.mrf.mxu3 }
 0x30f   : > { %v888_v28 = vmax.f32 %v2135_v23, 0.0 }
 0x311   : > { %v922_v37 = vmul.f32 %v2124_v42, %v888_v28 }
 0x313   : > { %v938_v4 = vadd.f32 %v922_v37, %v905_v31  ;;  %v914_v37 = vmul.f32 %v2122_v41, %v1876_v14 }
 0x315   : > { %v956_v56 = vsel %vm331_vm0, %v938_v4, 0.0 }
 0x316   : > { %957 = vadd.xlane.f32.xlu0 %v956_v56  ;;  %v2144_v24 = vpop.f32.mrf.mxu3 }
 0x317   : > { %v889_v2 = vmax.f32 %v2144_v24, 0.0 }
 0x319   : > { %v923_v5 = vmul.f32 %v2124_v42, %v889_v2 }
 0x31b   : > { %v939_v30 = vadd.f32 %v923_v5, %v906_v27 }
 0x31d   : > { %v959_v52 = vsel %vm331_vm0, %v939_v30, 0.0  ;;  %v915_v30 = vmul.f32 %v2122_v41, %v1881_v15 }
 0x31e   : > { %960 = vadd.xlane.f32.xlu1 %v959_v52  ;;  %v2153_v53 = vpop.f32.mrf.mxu3 }
 0x31f   : > { %v890_v20 = vmax.f32 %v2153_v53, 0.0 }
 0x321   : > { %v924_v54 = vmul.f32 %v2124_v42, %v890_v20 }
 0x323   : > { %v940_v6 = vadd.f32 %v924_v54, %v907_v18 }
 0x325   : > { %v962_v3 = vsel %vm331_vm0, %v940_v6, 0.0 }
 0x326   : > { %963 = vadd.xlane.f32.xlu1 %v962_v3  ;;  %v2162_v57 = vpop.f32.mrf.mxu3  ;;  %v916_v3 = vmul.f32 %v2122_v41, %v1895_v19 }
 0x327   : > { %v891_v33 = vmax.f32 %v2162_v57, 0.0 }
 0x329   : > { %v925_v7 = vmul.f32 %v2124_v42, %v891_v33 }
 0x32b   : > { %v941_v0 = vadd.f32 %v925_v7, %v908_v45 }
 0x32d   : > { %v965_v51 = vsel %vm331_vm0, %v941_v0, 0.0 }
 0x32e   : > { %966 = vadd.xlane.f32.xlu2 %v965_v51  ;;  %v2171_v32 = vpop.f32.mrf.mxu3 }
 0x32f   : > { %v892_v60 = vmax.f32 %v2171_v32, 0.0 }
 0x331   : > { %v926_v55 = vmul.f32 %v2124_v42, %v892_v60 }
 0x333   : > { %v942_v8 = vadd.f32 %v926_v55, %v909_v49  ;;  %v917_v49 = vmul.f32 %v2122_v41, %v1903_v21 }
 0x335   : > { %v968_v61 = vsel %vm331_vm0, %v942_v8, 0.0 }
 0x336   : > { %969 = vadd.xlane.f32.xlu2 %v968_v61  ;;  %v2180_v40 = vpop.f32.mrf.mxu3 }
 0x337   : > { %v893_v58 = vmax.f32 %v2180_v40, 0.0 }
 0x339   : > { %v927_v9 = vmul.f32 %v2124_v42, %v893_v58 }
 0x33b   : > { %v943_v16 = vadd.f32 %v927_v9, %v910_v29  ;;  %v918_v9 = vmul.f32 %v2122_v41, %v1908_v22 }
 0x33d   : > { %v971_v59 = vsel %vm331_vm0, %v943_v16, 0.0 }
 0x33e   : > { %972 = vadd.xlane.f32.xlu0 %v971_v59  ;;  %v2189_v38 = vpop.f32.mrf.mxu3 }
 0x33f   : > { %v894_v50 = vmax.f32 %v2189_v38, 0.0 }
 0x341   : > { %v928_v10 = vmul.f32 %v2124_v42, %v894_v50 }
 0x343   : > { %v944_v36 = vadd.f32 %v928_v10, %v911_v39 }
 0x345   : > { %v974_v46 = vsel %vm331_vm0, %v944_v36, 0.0  ;;  %v2399_v36 = vld [vmem:[#allocation6_spill] sm:$0xff] }
 0x346   : > { %975 = vadd.xlane.f32.xlu1 %v974_v46  ;;  %v2198_v47 = vpop.f32.mrf.mxu3  ;;  %v919_v46 = vmul.f32 %v2122_v41, %v2399_v36 }
 0x347   : > { %v895_v26 = vmax.f32 %v2198_v47, 0.0 }
 0x349   : > { %v929_v11 = vmul.f32 %v2124_v42, %v895_v26 }
 0x34b   : > { %v945_v62 = vadd.f32 %v929_v11, %v912_v43  ;;  %v2266_v11 = vstv %s1001_s24 }
 0x34d   : > { %v977_v35 = vsel %vm331_vm0, %v945_v62, 0.0 }
 0x34e   : > { %978 = vadd.xlane.f32.xlu2 %v977_v35  ;;  %v2207_v63 = vpop.f32.mrf.mxu3 }
 0x34f   : > { %v896_v48 = vmax.f32 %v2207_v63, 0.0 }
 0x351   : > { %v930_v12 = vmul.f32 %v2124_v42, %v896_v48 }
 0x353   : > { %v946_v34 = vadd.f32 %v930_v12, %v913_v44 }
 0x355   : > { %v980_v25 = vsel %vm331_vm0, %v946_v34, 0.0 }
 0x356   : > { %981 = vadd.xlane.f32.xlu0 %v980_v25  ;;  %v2216_v31 = vpop.f32.mrf.mxu3 }
 0x357   : > { %v897_v4 = vmax.f32 %v2216_v31, 0.0 }
 0x359   : > { %v931_v13 = vmul.f32 %v2124_v42, %v897_v4 }
 0x35b   : > { %v947_v56 = vadd.f32 %v931_v13, %v914_v37 }
 0x35d   : > { %v983_v27 = vsel %vm331_vm0, %v947_v56, 0.0 }
 0x35e   : > { %984 = vadd.xlane.f32.xlu1 %v983_v27  ;;  %v2225_v5 = vpop.f32.mrf.mxu3 }
 0x35f   : > { %v898_v52 = vmax.f32 %v2225_v5, 0.0 }
 0x361   : > { %v932_v14 = vmul.f32 %v2124_v42, %v898_v52 }
 0x363   : > { %v948_v18 = vadd.f32 %v932_v14, %v915_v30 }
 0x365   : > { %v986_v54 = vsel %vm331_vm0, %v948_v18, 0.0 }
 0x366   : > { %987 = vadd.xlane.f32.xlu2 %v986_v54  ;;  %v2234_v6 = vpop.f32.mrf.mxu3 }
 0x367   : > { %v899_v45 = vmax.f32 %v2234_v6, 0.0 }
 0x369   : > { %v933_v15 = vmul.f32 %v2124_v42, %v899_v45 }
 0x36b   : > { %v949_v7 = vadd.f32 %v933_v15, %v916_v3 }
 0x36d   : > { %v989_v0 = vsel %vm331_vm0, %v949_v7, 0.0 }
 0x36e   : > { %990 = vadd.xlane.f32.xlu0 %v989_v0  ;;  %v2243_v51 = vpop.f32.mrf.mxu3 }
 0x36f   : > { %v900_v55 = vmax.f32 %v2243_v51, 0.0 }
 0x371   : > { %v934_v19 = vmul.f32 %v2124_v42, %v900_v55 }
 0x373   : > { %v950_v8 = vadd.f32 %v934_v19, %v917_v49 }
 0x375   : > { %v992_v61 = vsel %vm331_vm0, %v950_v8, 0.0 }
 0x376   : > { %993 = vadd.xlane.f32.xlu1 %v992_v61  ;;  %v2252_v29 = vpop.f32.mrf.mxu3 }
 0x377   : > { %v901_v16 = vmax.f32 %v2252_v29, 0.0 }
 0x379   : > { %v935_v21 = vmul.f32 %v2124_v42, %v901_v16 }
 0x37b   : > { %v951_v59 = vadd.f32 %v935_v21, %v918_v9 }
 0x37d   : > { %v995_v39 = vsel %vm331_vm0, %v951_v59, 0.0 }
 0x37e   : > { %996 = vadd.xlane.f32.xlu2 %v995_v39  ;;  %v2261_v10 = vpop.f32.mrf.mxu3 }
 0x37f   : > { %v902_v43 = vmax.f32 %v2261_v10, 0.0 }
 0x381   : > { %v936_v22 = vmul.f32 %v2124_v42, %v902_v43  ;;  %v955_v62 = vpop.xlane.xlu0 %954 }
 0x382   : > { %v1003_v35 = vadd.f32 %v2266_v11, %v955_v62 }
 0x383   : > { %v952_v44 = vadd.f32 %v936_v22, %v919_v46 }
 0x384   : > { %v1536_v12 = vmul.f32 -1.442695, %v1003_v35 }
 0x385   : > { %v998_v34 = vsel %vm331_vm0, %v952_v44, 0.0 }
 0x386   : > { %1627 = vpow2.f32 %v1536_v12  ;;  %999 = vadd.xlane.f32.xlu0 %v998_v34 }
 0x389   : > { %v958_v25 = vpop.xlane.xlu0 %957 }
 0x38a   : > { %v1004_v41 = vadd.f32 %v2266_v11, %v958_v25 }
 0x38c   : > { %v1628_v37 = vpop.eup %1627  ;;  %v1537_v13 = vmul.f32 -1.442695, %v1004_v41  ;;  %v1691_v41 = vld [vmem:[%s1820_s15] sm:$0xff] }
 0x38d   : > { %v1067_v56 = vadd.f32 1.0, %v1628_v37 }
 0x38e   : > { %1629 = vpow2.f32 %v1537_v13 }
 0x38f   : > { %1631 = vrcp.f32 %v1067_v56  ;;  %v1094_v7 = vand.u32 2147483648, %v1067_v56  ;;  %v1092_v19 = vand.u32 2147483647, %v1067_v56  ;;  %vm1088_vm3 = vweird.f32 %v1067_v56 }
 0x391   : > { %v961_v27 = vpop.xlane.xlu1 %960  ;;  %v1095_v39 = vor.u32 1.1754944e-38, %v1094_v7  ;;  %vm1093_vm5 = vcmp.eq.f32.partialorder %v1092_v19, 8.507059e+37 }
 0x392   : > { %v1005_v42 = vadd.f32 %v2266_v11, %v961_v27 }
 0x394   : > { %v1630_v30 = vpop.eup %1629  ;;  %v1538_v14 = vmul.f32 -1.442695, %v1005_v42 }
 0x395   : > { %v1632_v18 = vpop.eup %1631  ;;  %v1068_v54 = vadd.f32 1.0, %v1630_v30 }
 0x396   : > { %v1084_v3 = vmul.f32 %v1632_v18, %v1067_v56  ;;  %1633 = vpow2.f32 %v1538_v14  ;;  %vm1089_vm2 = vweird.f32 %v1632_v18 }
 0x397   : > { %1635 = vrcp.f32 %v1068_v54  ;;  %vm1090_vm4 = vmor %vm1088_vm3, %vm1089_vm2  ;;  %v1107_v12 = vand.u32 2147483647, %v1068_v54  ;;  %v1109_v34 = vand.u32 2147483648, %v1068_v54  ;;  %vm1103_vm7 = vweird.f32 %v1068_v54 }
 0x398   : > { %v1085_v15 = vsub.f32 1.0, %v1084_v3 }
 0x399   : > { %v964_v0 = vpop.xlane.xlu1 %963  ;;  %v1110_v1 = vor.u32 1.1754944e-38, %v1109_v34  ;;  %vm1108_vm9 = vcmp.eq.f32.partialorder %v1107_v12, 8.507059e+37 }
 0x39a   : > { %v1086_v49 = vmul.f32 %v1632_v18, %v1085_v15  ;;  %v1006_v8 = vadd.f32 %v2266_v11, %v964_v0 }
 0x39c   : > { %v1634_v61 = vpop.eup %1633  ;;  %v1087_v9 = vadd.f32 %v1632_v18, %v1086_v49  ;;  %v1539_v21 = vmul.f32 -1.442695, %v1006_v8 }
 0x39d   : > { %v1636_v59 = vpop.eup %1635  ;;  %v1069_v36 = vadd.f32 1.0, %v1634_v61 }
 0x39e   : > { %v1091_v46 = vsel %vm1090_vm4, %v1632_v18, %v1087_v9  ;;  %v1099_v22 = vmul.f32 %v1636_v59, %v1068_v54  ;;  %1637 = vpow2.f32 %v1539_v21  ;;  %vm1104_vm6 = vweird.f32 %v1636_v59  ;;  %v1692_v9 = vld [vmem:[%s1820_s15 + $0x8] sm:$0xff] }
 0x39f   : > { %v1096_v62 = vsel %vm1093_vm5, %v1095_v39, %v1091_v46  ;;  %1639 = vrcp.f32 %v1069_v36  ;;  %vm1105_vm8 = vmor %vm1103_vm7, %vm1104_vm6  ;;  %v1122_v8 = vand.u32 2147483647, %v1069_v36  ;;  %v1124_v54 = vand.u32 2147483648, %v1069_v36 }
 0x3a0   : > { %v1339_v35 = vsub.f32 1.0, %v1096_v62  ;;  %v1100_v44 = vsub.f32 1.0, %v1099_v22  ;;  %v1323_v37 = vmul.f32 %v1691_v41, %v1096_v62  ;;  %vm1118_vm11 = vweird.f32 %v1069_v36 }
 0x3a1   : > { %v967_v25 = vpop.xlane.xlu2 %966  ;;  %v1125_v34 = vor.u32 1.1754944e-38, %v1124_v54  ;;  %vm1123_vm13 = vcmp.eq.f32.partialorder %v1122_v8, 8.507059e+37 }
 0x3a2   : > { %v1355_v13 = vmul.f32 %v1339_v35, %v887_v17  ;;  %v1101_v56 = vmul.f32 %v1636_v59, %v1100_v44  ;;  %v1007_v27 = vadd.f32 %v2266_v11, %v967_v25 }
 0x3a4   : > { %v1638_v42 = vpop.eup %1637  ;;  %v1371_v30 = vadd.f32 %v1355_v13, %v1323_v37  ;;  %v1102_v14 = vadd.f32 %v1636_v59, %v1101_v56  ;;  %v1540_v18 = vmul.f32 -1.442695, %v1007_v27 }
 0x3a5   : > { %v1640_v3 = vpop.eup %1639  ;;  %v1070_v17 = vadd.f32 1.0, %v1638_v42  ;;  %v1693_v42 = vld [vmem:[%s1820_s15 + $0x10] sm:$0xff] }
 0x3a6   : > { %1387 = vst.msk [vmem:[%s2285_s11] sm:$0xff] %vm331_vm0, %v1371_v30  ;;  %v1106_v15 = vsel %vm1105_vm8, %v1636_v59, %v1102_v14  ;;  %v1114_v7 = vmul.f32 %v1640_v3, %v1069_v36  ;;  %1641 = vpow2.f32 %v1540_v18  ;;  %vm1119_vm10 = vweird.f32 %v1640_v3 }
 0x3a7   : > { %v1111_v0 = vsel %vm1108_vm9, %v1110_v1, %v1106_v15  ;;  %1643 = vrcp.f32 %v1070_v17  ;;  %vm1120_vm12 = vmor %vm1118_vm11, %vm1119_vm10  ;;  %v1137_v56 = vand.u32 2147483647, %v1070_v17  ;;  %v1139_v36 = vand.u32 2147483648, %v1070_v17 }
 0x3a8   : > { %v1340_v49 = vsub.f32 1.0, %v1111_v0  ;;  %v1115_v19 = vsub.f32 1.0, %v1114_v7  ;;  %v1324_v21 = vmul.f32 %v1692_v9, %v1111_v0  ;;  %vm1133_vm15 = vweird.f32 %v1070_v17 }
 0x3a9   : > { %v970_v61 = vpop.xlane.xlu2 %969  ;;  %vm1138_vm2 = vcmp.eq.f32.partialorder %v1137_v56, 8.507059e+37 }
 0x3aa   : > { %v1356_v39 = vmul.f32 %v1340_v49, %v888_v28  ;;  %v1116_v46 = vmul.f32 %v1640_v3, %v1115_v19  ;;  %v1008_v59 = vadd.f32 %v2266_v11, %v970_v61  ;;  %v1140_v19 = vor.u32 1.1754944e-38, %v1139_v36 }
 0x3ac   : > { %v1642_v22 = vpop.eup %1641  ;;  %v1372_v62 = vadd.f32 %v1356_v39, %v1324_v21  ;;  %v1117_v35 = vadd.f32 %v1640_v3, %v1116_v46  ;;  %v1541_v44 = vmul.f32 -1.442695, %v1008_v59  ;;  %v1694_v46 = vld [vmem:[%s1820_s15 + $0x18] sm:$0xff] }
 0x3ad   : > { %v1644_v12 = vpop.eup %1643  ;;  %v1071_v25 = vadd.f32 1.0, %v1642_v22 }
 0x3ae   : > { %1388 = vst.msk [vmem:[%s2285_s11 + $0x8] sm:$0xff] %vm331_vm0, %v1372_v62  ;;  %v1121_v41 = vsel %vm1120_vm12, %v1640_v3, %v1117_v35  ;;  %v1129_v23 = vmul.f32 %v1644_v12, %v1070_v17  ;;  %1645 = vpow2.f32 %v1541_v44  ;;  %vm1134_vm14 = vweird.f32 %v1644_v12 }
 0x3af   : > { %v1126_v28 = vsel %vm1123_vm13, %v1125_v34, %v1121_v41  ;;  %1647 = vrcp.f32 %v1071_v25  ;;  %vm1135_vm1 = vmor %vm1133_vm15, %vm1134_vm14  ;;  %v1152_v21 = vand.u32 2147483647, %v1071_v25  ;;  %v1154_v17 = vand.u32 2147483648, %v1071_v25 }
 0x3b0   : > { %v1341_v37 = vsub.f32 1.0, %v1126_v28  ;;  %v1130_v13 = vsub.f32 1.0, %v1129_v23  ;;  %v1325_v30 = vmul.f32 %v1693_v42, %v1126_v28  ;;  %vm1148_vm4 = vweird.f32 %v1071_v25 }
 0x3b1   : > { %v973_v27 = vpop.xlane.xlu0 %972  ;;  %v1155_v28 = vor.u32 1.1754944e-38, %v1154_v17  ;;  %vm1153_vm6 = vcmp.eq.f32.partialorder %v1152_v21, 8.507059e+37 }
 0x3b2   : > { %v1357_v14 = vmul.f32 %v1341_v37, %v889_v2  ;;  %v1131_v18 = vmul.f32 %v1644_v12, %v1130_v13  ;;  %v1009_v3 = vadd.f32 %v2266_v11, %v973_v27 }
 0x3b4   : > { %v1646_v1 = vpop.eup %1645  ;;  %v1373_v15 = vadd.f32 %v1357_v14, %v1325_v30  ;;  %v1132_v7 = vadd.f32 %v1644_v12, %v1131_v18  ;;  %v1542_v0 = vmul.f32 -1.442695, %v1009_v3  ;;  %v1695_v30 = vld [vmem:[%s1820_s15 + $0x20] sm:$0xff] }
 0x3b5   : > { %v1648_v49 = vpop.eup %1647  ;;  %v1072_v8 = vadd.f32 1.0, %v1646_v1 }
 0x3b6   : > { %1389 = vst.msk [vmem:[%s2285_s11 + $0x10] sm:$0xff] %vm331_vm0, %v1373_v15  ;;  %v1136_v54 = vsel %vm1135_vm1, %v1644_v12, %v1132_v7  ;;  %v1144_v24 = vmul.f32 %v1648_v49, %v1071_v25  ;;  %1649 = vpow2.f32 %v1542_v0  ;;  %vm1149_vm3 = vweird.f32 %v1648_v49 }
 0x3b7   : > { %v1141_v2 = vsel %vm1138_vm2, %v1140_v19, %v1136_v54  ;;  %1651 = vrcp.f32 %v1072_v8  ;;  %vm1150_vm5 = vmor %vm1148_vm4, %vm1149_vm3  ;;  %v1167_v27 = vand.u32 2147483647, %v1072_v8  ;;  %v1169_v25 = vand.u32 2147483648, %v1072_v8 }
 0x3b8   : > { %v1342_v61 = vsub.f32 1.0, %v1141_v2  ;;  %v1145_v9 = vsub.f32 1.0, %v1144_v24  ;;  %v1326_v59 = vmul.f32 %v1694_v46, %v1141_v2  ;;  %vm1163_vm8 = vweird.f32 %v1072_v8 }
 0x3b9   : > { %v976_v39 = vpop.xlane.xlu1 %975  ;;  %v1170_v54 = vor.u32 1.1754944e-38, %v1169_v25  ;;  %vm1168_vm10 = vcmp.eq.f32.partialorder %v1167_v27, 8.507059e+37  ;;  %v1697_v27 = vld [vmem:[%s1820_s15 + $0x30] sm:$0xff] }
 0x3ba   : > { %v1358_v22 = vmul.f32 %v1342_v61, %v890_v20  ;;  %v1146_v62 = vmul.f32 %v1648_v49, %v1145_v9  ;;  %v1010_v35 = vadd.f32 %v2266_v11, %v976_v39  ;;  %v1696_v39 = vld [vmem:[%s1820_s15 + $0x28] sm:$0xff] }
 0x3bc   : > { %v1650_v44 = vpop.eup %1649  ;;  %v1374_v12 = vadd.f32 %v1358_v22, %v1326_v59  ;;  %v1147_v34 = vadd.f32 %v1648_v49, %v1146_v62  ;;  %v1543_v41 = vmul.f32 -1.442695, %v1010_v35 }
 0x3bd   : > { %v1652_v23 = vpop.eup %1651  ;;  %v1073_v37 = vadd.f32 1.0, %v1650_v44 }
 0x3be   : > { %1390 = vst.msk [vmem:[%s2285_s11 + $0x18] sm:$0xff] %vm331_vm0, %v1374_v12  ;;  %v1151_v13 = vsel %vm1150_vm5, %v1648_v49, %v1147_v34  ;;  %v1159_v53 = vmul.f32 %v1652_v23, %v1072_v8  ;;  %1653 = vpow2.f32 %v1543_v41  ;;  %vm1164_vm7 = vweird.f32 %v1652_v23 }
 0x3bf   : > { %v1156_v20 = vsel %vm1153_vm6, %v1155_v28, %v1151_v13  ;;  %1655 = vrcp.f32 %v1073_v37  ;;  %vm1165_vm9 = vmor %vm1163_vm8, %vm1164_vm7  ;;  %v1182_v21 = vand.u32 2147483647, %v1073_v37  ;;  %v1184_v8 = vand.u32 2147483648, %v1073_v37 }
 0x3c0   : > { %v1343_v56 = vsub.f32 1.0, %v1156_v20  ;;  %v1160_v36 = vsub.f32 1.0, %v1159_v53  ;;  %v1327_v14 = vmul.f32 %v1695_v30, %v1156_v20  ;;  %vm1178_vm12 = vweird.f32 %v1073_v37 }
 0x3c1   : > { %v979_v42 = vpop.xlane.xlu2 %978  ;;  %vm1183_vm14 = vcmp.eq.f32.partialorder %v1182_v21, 8.507059e+37 }
 0x3c2   : > { %v1359_v18 = vmul.f32 %v1343_v56, %v891_v33  ;;  %v1161_v3 = vmul.f32 %v1652_v23, %v1160_v36  ;;  %v1011_v1 = vadd.f32 %v2266_v11, %v979_v42 }
 0x3c4   : > { %v1654_v15 = vpop.eup %1653  ;;  %v1375_v7 = vadd.f32 %v1359_v18, %v1327_v14  ;;  %v1162_v0 = vadd.f32 %v1652_v23, %v1161_v3  ;;  %v1544_v49 = vmul.f32 -1.442695, %v1011_v1 }
 0x3c5   : > { %v1656_v19 = vpop.eup %1655  ;;  %v1074_v24 = vadd.f32 1.0, %v1654_v15 }
 0x3c6   : > { %1391 = vst.msk [vmem:[%s2285_s11 + $0x20] sm:$0xff] %vm331_vm0, %v1375_v7  ;;  %v1166_v2 = vsel %vm1165_vm9, %v1652_v23, %v1162_v0  ;;  %v1174_v57 = vmul.f32 %v1656_v19, %v1073_v37  ;;  %1657 = vpow2.f32 %v1544_v49  ;;  %vm1179_vm11 = vweird.f32 %v1656_v19 }
 0x3c7   : > { %v1171_v33 = vsel %vm1168_vm10, %v1170_v54, %v1166_v2  ;;  %1659 = vrcp.f32 %v1074_v24  ;;  %vm1180_vm13 = vmor %vm1178_vm12, %vm1179_vm11  ;;  %v1185_v23 = vor.u32 1.1754944e-38, %v1184_v8  ;;  %v1197_v56 = vand.u32 2147483647, %v1074_v24 }
 0x3c8   : > { %v1344_v61 = vsub.f32 1.0, %v1171_v33  ;;  %v1175_v9 = vsub.f32 1.0, %v1174_v57  ;;  %v1328_v46 = vmul.f32 %v1696_v39, %v1171_v33  ;;  %v1199_v37 = vand.u32 2147483648, %v1074_v24 }
 0x3c9   : > { %v982_v17 = vpop.xlane.xlu0 %981  ;;  %vm1193_vm1 = vweird.f32 %v1074_v24  ;;  %vm1198_vm3 = vcmp.eq.f32.partialorder %v1197_v56, 8.507059e+37 }
 0x3ca   : > { %v1360_v59 = vmul.f32 %v1344_v61, %v892_v60  ;;  %v1176_v22 = vmul.f32 %v1656_v19, %v1175_v9  ;;  %v1012_v62 = vadd.f32 %v2266_v11, %v982_v17  ;;  %v1200_v0 = vor.u32 1.1754944e-38, %v1199_v37  ;;  %v1698_v61 = vld [vmem:[%s1820_s15 + $0x38] sm:$0xff] }
 0x3cc   : > { %v1658_v35 = vpop.eup %1657  ;;  %v1376_v44 = vadd.f32 %v1360_v59, %v1328_v46  ;;  %v1177_v12 = vadd.f32 %v1656_v19, %v1176_v22  ;;  %v1545_v34 = vmul.f32 -1.442695, %v1012_v62 }
 0x3cd   : > { %v1660_v41 = vpop.eup %1659  ;;  %v1075_v28 = vadd.f32 1.0, %v1658_v35 }
 0x3ce   : > { %1392 = vst.msk [vmem:[%s2285_s11 + $0x28] sm:$0xff] %vm331_vm0, %v1376_v44  ;;  %v1181_v13 = vsel %vm1180_vm13, %v1656_v19, %v1177_v12  ;;  %v1189_v32 = vmul.f32 %v1660_v41, %v1074_v24  ;;  %1661 = vpow2.f32 %v1545_v34  ;;  %vm1194_vm15 = vweird.f32 %v1660_v41 }
 0x3cf   : > { %v1186_v60 = vsel %vm1183_vm14, %v1185_v23, %v1181_v13  ;;  %1663 = vrcp.f32 %v1075_v28  ;;  %vm1195_vm2 = vmor %vm1193_vm1, %vm1194_vm15  ;;  %v1212_v57 = vand.u32 2147483647, %v1075_v28  ;;  %v1214_v24 = vand.u32 2147483648, %v1075_v28 }
 0x3d0   : > { %v1345_v53 = vsub.f32 1.0, %v1186_v60  ;;  %v1190_v20 = vsub.f32 1.0, %v1189_v32  ;;  %v1329_v25 = vmul.f32 %v1697_v27, %v1186_v60  ;;  %vm1208_vm5 = vweird.f32 %v1075_v28  ;;  %v1699_v32 = vld [vmem:[%s1820_s15 + $0x40] sm:$0xff] }
 0x3d1   : > { %v985_v36 = vpop.xlane.xlu1 %984  ;;  %v1215_v35 = vor.u32 1.1754944e-38, %v1214_v24  ;;  %vm1213_vm7 = vcmp.eq.f32.partialorder %v1212_v57, 8.507059e+37 }
 0x3d2   : > { %v1361_v42 = vmul.f32 %v1345_v53, %v893_v58  ;;  %v1191_v30 = vmul.f32 %v1660_v41, %v1190_v20  ;;  %v1013_v14 = vadd.f32 %v2266_v11, %v985_v36 }
 0x3d4   : > { %v1662_v18 = vpop.eup %1661  ;;  %v1377_v3 = vadd.f32 %v1361_v42, %v1329_v25  ;;  %v1192_v1 = vadd.f32 %v1660_v41, %v1191_v30  ;;  %v1546_v15 = vmul.f32 -1.442695, %v1013_v14 }
 0x3d5   : > { %v1664_v7 = vpop.eup %1663  ;;  %v1076_v49 = vadd.f32 1.0, %v1662_v18 }
 0x3d6   : > { %1393 = vst.msk [vmem:[%s2285_s11 + $0x30] sm:$0xff] %vm331_vm0, %v1377_v3  ;;  %v1196_v19 = vsel %vm1195_vm2, %v1660_v41, %v1192_v1  ;;  %v1204_v40 = vmul.f32 %v1664_v7, %v1075_v28  ;;  %1665 = vpow2.f32 %v1546_v15  ;;  %vm1209_vm4 = vweird.f32 %v1664_v7 }
 0x3d7   : > { %v1201_v58 = vsel %vm1198_vm3, %v1200_v0, %v1196_v19  ;;  %1667 = vrcp.f32 %v1076_v49  ;;  %vm1210_vm6 = vmor %vm1208_vm5, %vm1209_vm4  ;;  %v1227_v23 = vand.u32 2147483647, %v1076_v49  ;;  %v1229_v28 = vand.u32 2147483648, %v1076_v49 }
 0x3d8   : > { %v1346_v54 = vsub.f32 1.0, %v1201_v58  ;;  %v1205_v2 = vsub.f32 1.0, %v1204_v40  ;;  %v1330_v9 = vmul.f32 %v1698_v61, %v1201_v58  ;;  %vm1223_vm9 = vweird.f32 %v1076_v49 }
 0x3d9   : > { %v988_v33 = vpop.xlane.xlu2 %987  ;;  %v1230_v30 = vor.u32 1.1754944e-38, %v1229_v28  ;;  %vm1228_vm11 = vcmp.eq.f32.partialorder %v1227_v23, 8.507059e+37 }
 0x3da   : > { %v1362_v21 = vmul.f32 %v1346_v54, %v894_v50  ;;  %v1206_v8 = vmul.f32 %v1664_v7, %v1205_v2  ;;  %v1014_v17 = vadd.f32 %v2266_v11, %v988_v33 }
 0x3dc   : > { %v1666_v39 = vpop.eup %1665  ;;  %v1378_v46 = vadd.f32 %v1362_v21, %v1330_v9  ;;  %v1207_v59 = vadd.f32 %v1664_v7, %v1206_v8  ;;  %v1547_v22 = vmul.f32 -1.442695, %v1014_v17 }
 0x3dd   : > { %v1668_v62 = vpop.eup %1667  ;;  %v1077_v44 = vadd.f32 1.0, %v1666_v39 }
 0x3de   : > { %1394 = vst.msk [vmem:[%s2285_s11 + $0x38] sm:$0xff] %vm331_vm0, %v1378_v46  ;;  %v1211_v12 = vsel %vm1210_vm6, %v1664_v7, %v1207_v59  ;;  %v1219_v38 = vmul.f32 %v1668_v62, %v1076_v49  ;;  %1669 = vpow2.f32 %v1547_v22  ;;  %vm1224_vm8 = vweird.f32 %v1668_v62  ;;  %v1700_v49 = vld [vmem:[%s1820_s15 + $0x48] sm:$0xff] }
 0x3df   : > { %v1216_v50 = vsel %vm1213_vm7, %v1215_v35, %v1211_v12  ;;  %1671 = vrcp.f32 %v1077_v44  ;;  %vm1225_vm10 = vmor %vm1223_vm9, %vm1224_vm8  ;;  %v1242_v15 = vand.u32 2147483647, %v1077_v44  ;;  %v1244_v7 = vand.u32 2147483648, %v1077_v44 }
 0x3e0   : > { %v1347_v34 = vsub.f32 1.0, %v1216_v50  ;;  %v1220_v41 = vsub.f32 1.0, %v1219_v38  ;;  %v1331_v60 = vmul.f32 %v1699_v32, %v1216_v50  ;;  %vm1238_vm13 = vweird.f32 %v1077_v44 }
 0x3e1   : > { %v991_v13 = vpop.xlane.xlu0 %990  ;;  %v1245_v9 = vor.u32 1.1754944e-38, %v1244_v7  ;;  %vm1243_vm15 = vcmp.eq.f32.partialorder %v1242_v15, 8.507059e+37 }
 0x3e2   : > { %v1363_v53 = vmul.f32 %v1347_v34, %v895_v26  ;;  %v1221_v20 = vmul.f32 %v1668_v62, %v1220_v41  ;;  %v1015_v56 = vadd.f32 %v2266_v11, %v991_v13 }
 0x3e4   : > { %v1670_v37 = vpop.eup %1669  ;;  %v1379_v36 = vadd.f32 %v1363_v53, %v1331_v60  ;;  %v1222_v27 = vadd.f32 %v1668_v62, %v1221_v20  ;;  %v1548_v25 = vmul.f32 -1.442695, %v1015_v56 }
 0x3e5   : > { %v1672_v42 = vpop.eup %1671  ;;  %v1078_v14 = vadd.f32 1.0, %v1670_v37 }
 0x3e6   : > { %1395 = vst.msk [vmem:[%s2285_s11 + $0x40] sm:$0xff] %vm331_vm0, %v1379_v36  ;;  %v1226_v18 = vsel %vm1225_vm10, %v1668_v62, %v1222_v27  ;;  %v1234_v47 = vmul.f32 %v1672_v42, %v1077_v44  ;;  %1673 = vpow2.f32 %v1548_v25  ;;  %vm1239_vm12 = vweird.f32 %v1672_v42  ;;  %v1701_v62 = vld [vmem:[%s1820_s15 + $0x50] sm:$0xff]  ;;  %v1702_v27 = vld [vmem:[%s1820_s15 + $0x58] sm:$0xff] }
 0x3e7   : > { %v1231_v26 = vsel %vm1228_vm11, %v1230_v30, %v1226_v18  ;;  %1675 = vrcp.f32 %v1078_v14  ;;  %vm1240_vm14 = vmor %vm1238_vm13, %vm1239_vm12  ;;  %v1257_v46 = vand.u32 2147483647, %v1078_v14  ;;  %v1259_v59 = vand.u32 2147483648, %v1078_v14 }
 0x3e8   : > { %v1348_v3 = vsub.f32 1.0, %v1231_v26  ;;  %v1235_v1 = vsub.f32 1.0, %v1234_v47  ;;  %v1332_v19 = vmul.f32 %v1700_v49, %v1231_v26  ;;  %vm1253_vm2 = vweird.f32 %v1078_v14 }
 0x3e9   : > { %v994_v0 = vpop.xlane.xlu1 %993  ;;  %v1260_v13 = vor.u32 1.1754944e-38, %v1259_v59  ;;  %vm1258_vm4 = vcmp.eq.f32.partialorder %v1257_v46, 8.507059e+37  ;;  %v1704_v59 = vld [vmem:[%s1820_s15 + $0x68] sm:$0xff] }
 0x3ea   : > { %v1364_v40 = vmul.f32 %v1348_v3, %v896_v48  ;;  %v1236_v58 = vmul.f32 %v1672_v42, %v1235_v1  ;;  %v1016_v54 = vadd.f32 %v2266_v11, %v994_v0 }
 0x3ec   : > { %v1674_v2 = vpop.eup %1673  ;;  %v1380_v57 = vadd.f32 %v1364_v40, %v1332_v19  ;;  %v1237_v24 = vadd.f32 %v1672_v42, %v1236_v58  ;;  %v1549_v33 = vmul.f32 -1.442695, %v1016_v54  ;;  %v1703_v58 = vld [vmem:[%s1820_s15 + $0x60] sm:$0xff] }
 0x3ed   : > { %v1676_v61 = vpop.eup %1675  ;;  %v1079_v21 = vadd.f32 1.0, %v1674_v2 }
 0x3ee   : > { %1396 = vst.msk [vmem:[%s2285_s11 + $0x48] sm:$0xff] %vm331_vm0, %v1380_v57  ;;  %v1241_v8 = vsel %vm1240_vm14, %v1672_v42, %v1237_v24  ;;  %v1249_v63 = vmul.f32 %v1676_v61, %v1078_v14  ;;  %1677 = vpow2.f32 %v1549_v33  ;;  %vm1254_vm1 = vweird.f32 %v1676_v61 }
 0x3ef   : > { %v1246_v48 = vsel %vm1243_vm15, %v1245_v9, %v1241_v8  ;;  %1679 = vrcp.f32 %v1079_v21  ;;  %vm1255_vm3 = vmor %vm1253_vm2, %vm1254_vm1  ;;  %v1272_v56 = vand.u32 2147483647, %v1079_v21  ;;  %v1274_v37 = vand.u32 2147483648, %v1079_v21 }
 0x3f0   : > { %v1349_v17 = vsub.f32 1.0, %v1246_v48  ;;  %v1250_v39 = vsub.f32 1.0, %v1249_v63  ;;  %v1333_v35 = vmul.f32 %v1701_v62, %v1246_v48  ;;  %vm1268_vm6 = vweird.f32 %v1079_v21 }
 0x3f1   : > { %v997_v22 = vpop.xlane.xlu2 %996  ;;  %v1275_v15 = vor.u32 1.1754944e-38, %v1274_v37  ;;  %vm1273_vm8 = vcmp.eq.f32.partialorder %v1272_v56, 8.507059e+37 }
 0x3f2   : > { %v1365_v44 = vmul.f32 %v1349_v17, %v897_v4  ;;  %v1251_v12 = vmul.f32 %v1676_v61, %v1250_v39  ;;  %v1017_v38 = vadd.f32 %v2266_v11, %v997_v22 }
 0x3f4   : > { %v1678_v50 = vpop.eup %1677  ;;  %v1381_v34 = vadd.f32 %v1365_v44, %v1333_v35  ;;  %v1252_v41 = vadd.f32 %v1676_v61, %v1251_v12  ;;  %v1550_v23 = vmul.f32 -1.442695, %v1017_v38 }
 0x3f5   : > { %v1680_v28 = vpop.eup %1679  ;;  %v1080_v32 = vadd.f32 1.0, %v1678_v50 }
 0x3f6   : > { %1397 = vst.msk [vmem:[%s2285_s11 + $0x50] sm:$0xff] %vm331_vm0, %v1381_v34  ;;  %v1256_v60 = vsel %vm1255_vm3, %v1676_v61, %v1252_v41  ;;  %v1264_v31 = vmul.f32 %v1680_v28, %v1079_v21  ;;  %1681 = vpow2.f32 %v1550_v23  ;;  %vm1269_vm5 = vweird.f32 %v1680_v28 }
 0x3f7   : > { %v1261_v4 = vsel %vm1258_vm4, %v1260_v13, %v1256_v60  ;;  %1683 = vrcp.f32 %v1080_v32  ;;  %vm1270_vm7 = vmor %vm1268_vm6, %vm1269_vm5  ;;  %v1287_v19 = vand.u32 2147483647, %v1080_v32  ;;  %v1289_v40 = vand.u32 2147483648, %v1080_v32 }
 0x3f8   : > { %v1350_v53 = vsub.f32 1.0, %v1261_v4  ;;  %v1265_v20 = vsub.f32 1.0, %v1264_v31  ;;  %v1334_v25 = vmul.f32 %v1702_v27, %v1261_v4  ;;  %vm1283_vm10 = vweird.f32 %v1080_v32 }
 0x3f9   : > { %v1000_v36 = vpop.xlane.xlu0 %999  ;;  %v1290_v21 = vor.u32 1.1754944e-38, %v1289_v40  ;;  %vm1288_vm12 = vcmp.eq.f32.partialorder %v1287_v19, 8.507059e+37 }
 0x3fa   : > { %v1366_v42 = vmul.f32 %v1350_v53, %v898_v52  ;;  %v1266_v30 = vmul.f32 %v1680_v28, %v1265_v20  ;;  %v1018_v14 = vadd.f32 %v2266_v11, %v1000_v36 }
 0x3fc   : > { %v1682_v18 = vpop.eup %1681  ;;  %v1382_v47 = vadd.f32 %v1366_v42, %v1334_v25  ;;  %v1267_v26 = vadd.f32 %v1680_v28, %v1266_v30  ;;  %v1551_v3 = vmul.f32 -1.442695, %v1018_v14  ;;  %v1706_v25 = vld [vmem:[%s1820_s15 + $0x78] sm:$0xff] }
 0x3fd   : > { %v1684_v1 = vpop.eup %1683  ;;  %v1081_v7 = vadd.f32 1.0, %v1682_v18 }
 0x3fe   : > { %1398 = vst.msk [vmem:[%s2285_s11 + $0x58] sm:$0xff] %vm331_vm0, %v1382_v47  ;;  %v1271_v0 = vsel %vm1270_vm7, %v1680_v28, %v1267_v26  ;;  %v1279_v5 = vmul.f32 %v1684_v1, %v1080_v32  ;;  %1685 = vpow2.f32 %v1551_v3  ;;  %vm1284_vm9 = vweird.f32 %v1684_v1  ;;  %v1705_v32 = vld [vmem:[%s1820_s15 + $0x70] sm:$0xff] }
 0x3ff   : > { %v1276_v52 = vsel %vm1273_vm8, %v1275_v15, %v1271_v0  ;;  %1687 = vrcp.f32 %v1081_v7  ;;  %vm1285_vm11 = vmor %vm1283_vm10, %vm1284_vm9  ;;  %v1302_v39 = vand.u32 2147483647, %v1081_v7  ;;  %v1304_v46 = vand.u32 2147483648, %v1081_v7 }
 0x400   : > { %v1351_v11 = vsub.f32 1.0, %v1276_v52  ;;  %v1280_v49 = vsub.f32 1.0, %v1279_v5  ;;  %v1335_v54 = vmul.f32 %v1703_v58, %v1276_v52  ;;  %vm1298_vm14 = vweird.f32 %v1081_v7 }
 0x401   : > { %v1305_v50 = vor.u32 1.1754944e-38, %v1304_v46  ;;  %vm1303_vm1 = vcmp.eq.f32.partialorder %v1302_v39, 8.507059e+37 }
 0x402   : > { %v1367_v2 = vmul.f32 %v1351_v11, %v899_v45  ;;  %v1281_v57 = vmul.f32 %v1684_v1, %v1280_v49 }
 0x404   : > { %v1686_v24 = vpop.eup %1685  ;;  %v1383_v33 = vadd.f32 %v1367_v2, %v1335_v54  ;;  %v1282_v61 = vadd.f32 %v1684_v1, %v1281_v57 }
 0x405   : > { %v1688_v9 = vpop.eup %1687  ;;  %v1082_v8 = vadd.f32 1.0, %v1686_v24 }
 0x406   : > { %1399 = vst.msk [vmem:[%s2285_s11 + $0x60] sm:$0xff] %vm331_vm0, %v1383_v33  ;;  %v1286_v63 = vsel %vm1285_vm11, %v1684_v1, %v1282_v61  ;;  %v1294_v48 = vmul.f32 %v1688_v9, %v1081_v7  ;;  %vm1299_vm13 = vweird.f32 %v1688_v9 }
 0x407   : > { %v1291_v17 = vsel %vm1288_vm12, %v1290_v21, %v1286_v63  ;;  %1689 = vrcp.f32 %v1082_v8  ;;  %vm1300_vm15 = vmor %vm1298_vm14, %vm1299_vm13  ;;  %v1317_v51 = vand.u32 2147483647, %v1082_v8  ;;  %vm1313_vm3 = vweird.f32 %v1082_v8 }
 0x408   : > { %v1352_v6 = vsub.f32 1.0, %v1291_v17  ;;  %v1295_v45 = vsub.f32 1.0, %v1294_v48  ;;  %v1336_v22 = vmul.f32 %v1704_v59, %v1291_v17 }
 0x409   : > { %vm1318_vm5 = vcmp.eq.f32.partialorder %v1317_v51, 8.507059e+37 }
 0x40a   : > { %v1368_v62 = vmul.f32 %v1352_v6, %v900_v55  ;;  %v1296_v35 = vmul.f32 %v1688_v9, %v1295_v45  ;;  %v1319_v55 = vand.u32 2147483648, %v1082_v8 }
 0x40c   : > { %v1384_v44 = vadd.f32 %v1368_v62, %v1336_v22  ;;  %v1297_v12 = vadd.f32 %v1688_v9, %v1296_v35  ;;  %v1320_v56 = vor.u32 1.1754944e-38, %v1319_v55 }
 0x40d   : > { %v1690_v38 = vpop.eup %1689 }
 0x40e   : > { %1400 = vst.msk [vmem:[%s2285_s11 + $0x68] sm:$0xff] %vm331_vm0, %v1384_v44  ;;  %v1301_v34 = vsel %vm1300_vm15, %v1688_v9, %v1297_v12  ;;  %v1309_v41 = vmul.f32 %v1690_v38, %v1082_v8  ;;  %vm1314_vm2 = vweird.f32 %v1690_v38 }
 0x40f   : > { %v1306_v23 = vsel %vm1303_vm1, %v1305_v50, %v1301_v34  ;;  %vm1315_vm4 = vmor %vm1313_vm3, %vm1314_vm2 }
 0x410   : > { %v1353_v28 = vsub.f32 1.0, %v1306_v23  ;;  %v1310_v13 = vsub.f32 1.0, %v1309_v41  ;;  %v1337_v60 = vmul.f32 %v1705_v32, %v1306_v23 }
 0x412   : > { %v1369_v31 = vmul.f32 %v1353_v28, %v901_v16  ;;  %v1311_v4 = vmul.f32 %v1690_v38, %v1310_v13 }
 0x414   : > { %v1385_v53 = vadd.f32 %v1369_v31, %v1337_v60  ;;  %v1312_v20 = vadd.f32 %v1690_v38, %v1311_v4 }
 0x416   : > { %1401 = vst.msk [vmem:[%s2285_s11 + $0x70] sm:$0xff] %vm331_vm0, %v1385_v53  ;;  %v1316_v37 = vsel %vm1315_vm4, %v1690_v38, %v1312_v20 }
 0x417   : > { %v1321_v36 = vsel %vm1318_vm5, %v1320_v56, %v1316_v37 }
 0x418   : > { %v1354_v27 = vsub.f32 1.0, %v1321_v36  ;;  %v1338_v42 = vmul.f32 %v1706_v25, %v1321_v36 }
 0x41a   : > { %v1370_v29 = vmul.f32 %v1354_v27, %v902_v43 }
 0x41c   : > { %v1386_v16 = vadd.f32 %v1370_v29, %v1338_v42 }
 0x41e   : > { %1402 = vst.msk [vmem:[%s2285_s11 + $0x78] sm:$0xff] %vm331_vm0, %v1386_v16 }
 0x41f PF: > { %s18_s23 = sadd.s32 1, %s1747_s23  }
 0x420   : > { %p15_p8 = scmp.ge.s32.totalorder %s18_s23, 4  }
 0x422   :  { %17 = sbr.rel (!%p15_p8) target bundleno = 3 (0x3), region = 82 }
 0x427   :  { %1425 = vsyncpa [#allocation4], 1 }
 0x428   :  { %1427 = vsyncpa [#allocation4 + $0x1], 1 }

</bundles_post_ra>
